<compile_context>
chip_gen: v7x
topology: tpu7x:2x2x1
jax: 0.10.0
libtpu: 0.0.40
codegen_flags: <defaults>
</compile_context>

<pallas_src>
import jax
import jax.numpy as jnp
from jax.experimental import pallas as pl
from jax.experimental.pallas import tpu as pltpu


def _round_up(x, m):
    return (x + m - 1) // m * m


def _mlp_kernel(x_ref, w1_ref, b1_ref, w2_ref, b2_ref, w3_ref, b3_ref, o_ref):
    # One (TB, F) batch tile per grid step; weights/biases have constant index
    # maps so they are fetched once and stay VMEM resident across grid steps.
    # x arrives as f32 and is cast to bf16 here (in-kernel, hidden under MXU).
    x = x_ref[...].astype(jnp.bfloat16)                              # (TB, F)
    h1 = jnp.dot(x, w1_ref[...], preferred_element_type=jnp.float32)
    h1 = jnp.maximum(h1 + b1_ref[...], 0.0)                          # (TB, 512) f32
    h2 = jnp.dot(h1.astype(jnp.bfloat16), w2_ref[...],
                 preferred_element_type=jnp.float32)
    h2 = jnp.maximum(h2 + b2_ref[...], 0.0)                          # (TB, 512) f32
    out = jnp.dot(h2.astype(jnp.bfloat16), w3_ref[...],
                  preferred_element_type=jnp.float32)
    o_ref[...] = (out + b3_ref[...]).astype(o_ref.dtype)             # (TB, O_pad)


def prepare_params(params):
    """One-time conversion of f32 Linear params into kernel-ready form.

    Hoisted out of the per-call path: bf16 weight casts, bias reshape to
    (1, H), and lane-padding of the final layer (O -> multiple of 128) all
    happen once here instead of on every forward call.
    """
    w1, b1, w2, b2, w3, b3 = params
    H = w1.shape[1]
    O = w3.shape[1]
    O_pad = _round_up(O, 128)
    w3p = jnp.zeros((H, O_pad), jnp.bfloat16).at[:, :O].set(w3.astype(jnp.bfloat16))
    b3p = jnp.zeros((1, O_pad), jnp.float32).at[0, :O].set(b3.astype(jnp.float32))
    return dict(
        w1=w1.astype(jnp.bfloat16),
        b1=b1.reshape(1, H).astype(jnp.float32),
        w2=w2.astype(jnp.bfloat16),
        b2=b2.reshape(1, H).astype(jnp.float32),
        w3=w3p,
        b3=b3p,
        out_dim=O,
    )


def _choose_tb(B, tb):
    """Pick the batch tile: multiple of 8, default 512, >=2 grid steps when possible."""
    B8 = _round_up(B, 8)
    TB = min(_round_up(min(tb, B8), 8), B8)
    # v7x: a 1-step grid leaves one TensorCore idle; split when there is room.
    if B8 // TB < 2 and B8 >= 16:
        TB = _round_up(pl.cdiv(B8, 2), 8)
    B_pad = _round_up(B8, TB)
    return TB, B_pad


def _vmem_limit_bytes(TB, F, H, O_pad):
    """Scoped-VMEM budget from the actual resident footprint (+ headroom)."""
    x_tiles = 2 * TB * F * 4            # f32 x tile, double-buffered
    out_tiles = 2 * TB * O_pad * 4      # f32 out tile, double-buffered
    weights = 2 * 2 * (F * H + H * H + H * O_pad)   # bf16, default 2 buffers
    biases = 2 * 4 * (2 * H + O_pad)
    acts = 3 * TB * H * 4               # h1/h2 f32 + bf16 temporaries (rough)
    total = int((x_tiles + out_tiles + weights + biases + acts) * 1.25) + (4 << 20)
    return max(16 << 20, min(total, 64 << 20))


def nn_forward(x_nchw, prepared, *, tb=512):
    """Forward pass of NN. x_nchw: (N, C, H, W) float32, params from prepare_params()."""
    w1, b1 = prepared["w1"], prepared["b1"]
    w2, b2 = prepared["w2"], prepared["b2"]
    w3, b3 = prepared["w3"], prepared["b3"]
    O = prepared["out_dim"]

    B = x_nchw.shape[0]
    x_flat = x_nchw.reshape(B, -1)                   # nn.Flatten(); stays f32
    F = x_flat.shape[1]
    H = w1.shape[1]
    O_pad = w3.shape[1]

    TB, B_pad = _choose_tb(B, tb)
    if B_pad != B:
        x_flat = jnp.pad(x_flat, ((0, B_pad - B), (0, 0)))
    grid = (B_pad // TB,)

    out = pl.pallas_call(
        _mlp_kernel,
        out_shape=jax.ShapeDtypeStruct((B_pad, O_pad), jnp.float32),
        grid=grid,
        in_specs=[
            pl.BlockSpec((TB, F), lambda i: (i, 0)),       # x tile (streamed, f32)
            pl.BlockSpec((F, H), lambda i: (0, 0)),        # w1 (VMEM resident)
            pl.BlockSpec((1, H), lambda i: (0, 0)),        # b1
            pl.BlockSpec((H, H), lambda i: (0, 0)),        # w2
            pl.BlockSpec((1, H), lambda i: (0, 0)),        # b2
            pl.BlockSpec((H, O_pad), lambda i: (0, 0)),    # w3 (lane-padded)
            pl.BlockSpec((1, O_pad), lambda i: (0, 0)),    # b3 (lane-padded)
        ],
        out_specs=pl.BlockSpec((TB, O_pad), lambda i: (i, 0)),
        compiler_params=pltpu.CompilerParams(
            dimension_semantics=("parallel",),
            vmem_limit_bytes=_vmem_limit_bytes(TB, F, H, O_pad),
        ),
    )(x_flat, w1, b1, w2, b2, w3, b3)

    return out[:B, :O]


def init_params(key, input_size, output_size, hidden=512):
    """Deterministic init mirroring nn.Linear's U(-1/sqrt(fan_in), +1/sqrt(fan_in))."""
    ks = jax.random.split(key, 6)

    def lin(kw, kb, fan_in, fan_out):
        bound = 1.0 / jnp.sqrt(jnp.float32(fan_in))
        w = jax.random.uniform(kw, (fan_in, fan_out), jnp.float32, -bound, bound)
        b = jax.random.uniform(kb, (fan_out,), jnp.float32, -bound, bound)
        return w, b

    w1, b1 = lin(ks[0], ks[1], input_size, hidden)
    w2, b2 = lin(ks[2], ks[3], hidden, hidden)
    w3, b3 = lin(ks[4], ks[5], hidden, output_size)
    return (w1, b1, w2, b2, w3, b3)


def reference_forward(x_nchw, params):
    """Pure-JAX f32 reference of the original module semantics."""
    w1, b1, w2, b2, w3, b3 = params
    x = x_nchw.reshape(x_nchw.shape[0], -1)
    h1 = jnp.maximum(x @ w1 + b1, 0.0)
    h2 = jnp.maximum(h1 @ w2 + b2, 0.0)
    return h2 @ w3 + b3


def reference_forward_bf16(x_nchw, params):
    """Reference mirroring the kernel's bf16-input / f32-accumulate math."""
    w1, b1, w2, b2, w3, b3 = params
    bf = jnp.bfloat16
    x = x_nchw.reshape(x_nchw.shape[0], -1).astype(bf)
    h1 = jnp.dot(x, w1.astype(bf), preferred_element_type=jnp.float32) + b1
    h1 = jnp.maximum(h1, 0.0)
    h2 = jnp.dot(h1.astype(bf), w2.astype(bf), preferred_element_type=jnp.float32) + b2
    h2 = jnp.maximum(h2, 0.0)
    return jnp.dot(h2.astype(bf), w3.astype(bf), preferred_element_type=jnp.float32) + b3


if __name__ == "__main__":
    key = jax.random.PRNGKey(0)
    k_x, k_p = jax.random.split(key)

    # Small, module-consistent shapes: batch=8 NCHW images, flattened
    # input_size = 4*16*16 = 1024, output_size = 10 classes.
    B, C, Himg, Wimg = 8, 4, 16, 16
    input_size = C * Himg * Wimg
    output_size = 10

    x = jax.random.normal(k_x, (B, C, Himg, Wimg), jnp.float32)
    params = init_params(k_p, input_size, output_size)
    prepared = prepare_params(params)     # one-time: bf16 casts + lane padding

    out = jax.block_until_ready(nn_forward(x, prepared))
    assert out.shape == (B, output_size), out.shape

    # Tight check against a reference with identical bf16-weight math.
    ref_q = reference_forward_bf16(x, params)
    assert jnp.allclose(out, ref_q, atol=1e-3, rtol=1e-3), (
        float(jnp.max(jnp.abs(out - ref_q))))

    # Loose check against the full-f32 module semantics (bf16 quantization).
    ref_f32 = reference_forward(x, params)
    assert jnp.allclose(out, ref_f32, atol=5e-2, rtol=5e-2), (
        float(jnp.max(jnp.abs(out - ref_f32))))

    print("KERNEL_OK")
</pallas_src>

<mosaic_0001>
module attributes {stable_mosaic.version = 11 : i64} {
  func.func @_mlp_kernel(%arg0: i32, %arg1: memref<8x1024xf32, #tpu.memory_space<vmem>>, %arg2: memref<1024x512xbf16, #tpu.memory_space<vmem>>, %arg3: memref<1x512xf32, #tpu.memory_space<vmem>>, %arg4: memref<512x512xbf16, #tpu.memory_space<vmem>>, %arg5: memref<1x512xf32, #tpu.memory_space<vmem>>, %arg6: memref<512x128xbf16, #tpu.memory_space<vmem>>, %arg7: memref<1x128xf32, #tpu.memory_space<vmem>>, %arg8: memref<8x128xf32, #tpu.memory_space<vmem>>) attributes {dimension_semantics = [#tpu.dimension_semantics<parallel>], iteration_bounds = array<i64: 1>, scalar_prefetch = 0 : i64, scratch_operands = 0 : i64, tpu.core_type = #tpu.core_type<tc>, window_params = [{transform_indices = @transform_0, window_bounds = array<i64: 8, 1024>}, {pipeline_mode = #tpu.pipeline_mode<synchronous>, transform_indices = @transform_1, window_bounds = array<i64: 1024, 512>}, {pipeline_mode = #tpu.pipeline_mode<synchronous>, transform_indices = @transform_2, window_bounds = array<i64: 1, 512>}, {pipeline_mode = #tpu.pipeline_mode<synchronous>, transform_indices = @transform_3, window_bounds = array<i64: 512, 512>}, {pipeline_mode = #tpu.pipeline_mode<synchronous>, transform_indices = @transform_4, window_bounds = array<i64: 1, 512>}, {pipeline_mode = #tpu.pipeline_mode<synchronous>, transform_indices = @transform_5, window_bounds = array<i64: 512, 128>}, {pipeline_mode = #tpu.pipeline_mode<synchronous>, transform_indices = @transform_6, window_bounds = array<i64: 1, 128>}, {transform_indices = @transform_7, window_bounds = array<i64: 8, 128>}]} {
    %c0 = arith.constant 0 : index
    %c0_0 = arith.constant 0 : index
    %0 = vector.load %arg1[%c0, %c0_0] : memref<8x1024xf32, #tpu.memory_space<vmem>>, vector<8x1024xf32>
    %1 = arith.truncf %0 : vector<8x1024xf32> to vector<8x1024xbf16>
    %c0_1 = arith.constant 0 : index
    %c0_2 = arith.constant 0 : index
    %2 = vector.load %arg2[%c0_1, %c0_2] : memref<1024x512xbf16, #tpu.memory_space<vmem>>, vector<1024x512xbf16>
    %cst = arith.constant dense<0.000000e+00> : vector<8x512xf32>
    %3 = tpu.matmul %1, %2, %cst {dimension_numbers = #tpu.dot_dimension_numbers<[1], [0], [0], [1], [0, 0, 1, 1], [], []>} : vector<8x1024xbf16>, vector<1024x512xbf16>, vector<8x512xf32> -> vector<8x512xf32>
    %c0_3 = arith.constant 0 : index
    %c0_4 = arith.constant 0 : index
    %4 = vector.load %arg3[%c0_3, %c0_4] : memref<1x512xf32, #tpu.memory_space<vmem>>, vector<1x512xf32>
    %5 = vector.broadcast %4 : vector<1x512xf32> to vector<8x512xf32>
    %6 = arith.addf %3, %5 : vector<8x512xf32>
    %cst_5 = arith.constant 0.000000e+00 : f32
    %7 = vector.broadcast %cst_5 : f32 to vector<8x512xf32>
    %8 = arith.maximumf %6, %7 : vector<8x512xf32>
    %9 = arith.truncf %8 : vector<8x512xf32> to vector<8x512xbf16>
    %c0_6 = arith.constant 0 : index
    %c0_7 = arith.constant 0 : index
    %10 = vector.load %arg4[%c0_6, %c0_7] : memref<512x512xbf16, #tpu.memory_space<vmem>>, vector<512x512xbf16>
    %cst_8 = arith.constant dense<0.000000e+00> : vector<8x512xf32>
    %11 = tpu.matmul %9, %10, %cst_8 {dimension_numbers = #tpu.dot_dimension_numbers<[1], [0], [0], [1], [0, 0, 1, 1], [], []>} : vector<8x512xbf16>, vector<512x512xbf16>, vector<8x512xf32> -> vector<8x512xf32>
    %c0_9 = arith.constant 0 : index
    %c0_10 = arith.constant 0 : index
    %12 = vector.load %arg5[%c0_9, %c0_10] : memref<1x512xf32, #tpu.memory_space<vmem>>, vector<1x512xf32>
    %13 = vector.broadcast %12 : vector<1x512xf32> to vector<8x512xf32>
    %14 = arith.addf %11, %13 : vector<8x512xf32>
    %cst_11 = arith.constant 0.000000e+00 : f32
    %15 = vector.broadcast %cst_11 : f32 to vector<8x512xf32>
    %16 = arith.maximumf %14, %15 : vector<8x512xf32>
    %17 = arith.truncf %16 : vector<8x512xf32> to vector<8x512xbf16>
    %c0_12 = arith.constant 0 : index
    %c0_13 = arith.constant 0 : index
    %18 = vector.load %arg6[%c0_12, %c0_13] : memref<512x128xbf16, #tpu.memory_space<vmem>>, vector<512x128xbf16>
    %cst_14 = arith.constant dense<0.000000e+00> : vector<8x128xf32>
    %19 = tpu.matmul %17, %18, %cst_14 {dimension_numbers = #tpu.dot_dimension_numbers<[1], [0], [0], [1], [0, 0, 1, 1], [], []>} : vector<8x512xbf16>, vector<512x128xbf16>, vector<8x128xf32> -> vector<8x128xf32>
    %c0_15 = arith.constant 0 : index
    %c0_16 = arith.constant 0 : index
    %20 = vector.load %arg7[%c0_15, %c0_16] : memref<1x128xf32, #tpu.memory_space<vmem>>, vector<1x128xf32>
    %21 = vector.broadcast %20 : vector<1x128xf32> to vector<8x128xf32>
    %22 = arith.addf %19, %21 : vector<8x128xf32>
    %c0_17 = arith.constant 0 : index
    %c0_18 = arith.constant 0 : index
    %23 = vector.load %arg8[%c0_17, %c0_18] : memref<8x128xf32, #tpu.memory_space<vmem>>, vector<8x128xf32>
    tpu.vector_store %arg8[%c0_17, %c0_18], %22 {strides = array<i32>} : memref<8x128xf32, #tpu.memory_space<vmem>>, vector<8x128xf32>,
    return
  }
  func.func @transform_0(%arg0: i32) -> (i32, i32) {
    %c0_i32 = arith.constant 0 : i32
    %c0_i32_0 = arith.constant 0 : i32
    return %arg0, %c0_i32 : i32, i32
  }
  func.func @transform_1(%arg0: i32) -> (i32, i32) {
    %c0_i32 = arith.constant 0 : i32
    %c0_i32_0 = arith.constant 0 : i32
    %c0_i32_1 = arith.constant 0 : i32
    return %c0_i32, %c0_i32_0 : i32, i32
  }
  func.func @transform_2(%arg0: i32) -> (i32, i32) {
    %c0_i32 = arith.constant 0 : i32
    %c0_i32_0 = arith.constant 0 : i32
    %c0_i32_1 = arith.constant 0 : i32
    return %c0_i32, %c0_i32_0 : i32, i32
  }
  func.func @transform_3(%arg0: i32) -> (i32, i32) {
    %c0_i32 = arith.constant 0 : i32
    %c0_i32_0 = arith.constant 0 : i32
    %c0_i32_1 = arith.constant 0 : i32
    return %c0_i32, %c0_i32_0 : i32, i32
  }
  func.func @transform_4(%arg0: i32) -> (i32, i32) {
    %c0_i32 = arith.constant 0 : i32
    %c0_i32_0 = arith.constant 0 : i32
    %c0_i32_1 = arith.constant 0 : i32
    return %c0_i32, %c0_i32_0 : i32, i32
  }
  func.func @transform_5(%arg0: i32) -> (i32, i32) {
    %c0_i32 = arith.constant 0 : i32
    %c0_i32_0 = arith.constant 0 : i32
    %c0_i32_1 = arith.constant 0 : i32
    return %c0_i32, %c0_i32_0 : i32, i32
  }
  func.func @transform_6(%arg0: i32) -> (i32, i32) {
    %c0_i32 = arith.constant 0 : i32
    %c0_i32_0 = arith.constant 0 : i32
    %c0_i32_1 = arith.constant 0 : i32
    return %c0_i32, %c0_i32_0 : i32, i32
  }
  func.func @transform_7(%arg0: i32) -> (i32, i32) {
    %c0_i32 = arith.constant 0 : i32
    %c0_i32_0 = arith.constant 0 : i32
    return %arg0, %c0_i32 : i32, i32
  }
}

</mosaic_0001>

<bundles_post_ra>
// kernel: tpu_custom_call.1
= control target key start
LH: loop header
LB: loop body
LE: loop exit
PB: predicated region body
PF: predicated region fallthrough
CT: control target
= control target key end

     0   :  { %12 = vsyncpa [#allocation3], 0  ;;  %s4705_s0 = inlined_call_operand.hbm [shape: f32[8,1024], index: 0, kind: input, shape index: {}]   ;;  %s4706_s1 = inlined_call_operand.hbm [shape: bf16[1024,512], index: 1, kind: input, shape index: {}]   ;;  %s4707_s2 = inlined_call_operand.vmem [shape: f32[1,512], index: 2, kind: input, shape index: {}]   ;;  %s4708_s3 = inlined_call_operand.hbm [shape: bf16[512,512], index: 3, kind: input, shape index: {}]   ;;  %s4709_s4 = inlined_call_operand.vmem [shape: f32[1,512], index: 4, kind: input, shape index: {}]   ;;  %s4710_s5 = inlined_call_operand.hbm [shape: bf16[512,128], index: 5, kind: input, shape index: {}]   ;;  %s4711_s6 = inlined_call_operand.vmem [shape: f32[1,128], index: 6, kind: input, shape index: {}]   ;;  %s4712_s7 = inlined_call_operand.hbm [shape: f32[8,128], index: 7, kind: output, shape index: {}]  }
   0x1   :  { %13 = vsyncpa [#allocation6], 0 }
   0x2   :  { %14 = vsyncpa [#allocation9], 0 }
   0x3   :  { %15 = vsyncpa [#allocation4], 0  ;;  %s4550_s24 = smov [#allocation5]   ;;  %s4432_s28 = scalar_lea.hbm %s4706_s1, 32768 }
   0x4   :  { %s31_s25 = sshll.u32 %s4550_s24, 4  ;;  %p4433_p0 = scmp.ne.s32.totalorder %s4706_s1, %s4432_s28  ;;  %s32_s25 = int_to_ptr.vmem [resolvable:$true] %s31_s25 }
   0x5   :  { %p4436_p1 = scmp.lt.u32.totalorder %s4432_s28, %s4706_s1 }
   0x7   :  { %p4438_p2 = pnand %p4436_p1, %p4433_p0 }
   0x9   :  { %4441 = shalt.err (!%p4438_p2)
}
   0xa   :  { %s4442_s10 = scalar_lea.vmem %s32_s25, 32768  ;;  %p4447_p4 = scmp.lt.s32.totalorder %s32_s25, %s32_s25 }
   0xb   :  { %p4443_p3 = scmp.ne.s32.totalorder %s32_s25, %s4442_s10  ;;  %p4448_p5 = scmp.lt.s32.totalorder %s4442_s10, %s4442_s10 }
   0xd   :  { %p4449_p6 = por %p4448_p5, %p4447_p4 }
   0xf   :  { %p4450_p7 = pnand %p4449_p6, %p4443_p3 }
  0x11   :  { %4453 = shalt.err (!%p4450_p7)
}
  0x12   :  { %s4551_s11 = smov 256   ;;  %s4552_s12 = smov 16  }
  0x13   :  { %37 = dma.hbm_to_vmem [thread:$0]  %s4706_s1, 32768, %s32_s25, [#allocation6], %s4551_s11, %s4551_s11, %s4552_s12  }
  0x14   :  { %s4553_s15 = smov [#allocation2]   ;;  %s4554_s17 = smov [#allocation7]  }
  0x15   :  { %s22_s16 = sshll.u32 %s4553_s15, 4  ;;  %s45_s18 = sshll.u32 %s4554_s17, 4  ;;  %s23_s16 = int_to_ptr.vmem [resolvable:$true] %s22_s16  ;;  %s46_s18 = int_to_ptr.vmem [resolvable:$true] %s45_s18 }
  0x16   :  { %s4454_s21 = scalar_lea.hbm %s4705_s0, 1024 }
  0x17   :  { %p4455_p8 = scmp.ne.s32.totalorder %s4705_s0, %s4454_s21  ;;  %p4458_p9 = scmp.lt.u32.totalorder %s4454_s21, %s4705_s0 }
  0x19   :  { %p4460_p10 = pnand %p4458_p9, %p4455_p8 }
  0x1b   :  { %4463 = shalt.err (!%p4460_p10)
}
  0x1c   :  { %s4464_s1 = scalar_lea.vmem %s23_s16, 1024  ;;  %p4469_p12 = scmp.lt.s32.totalorder %s23_s16, %s23_s16 }
  0x1d   :  { %p4465_p11 = scmp.ne.s32.totalorder %s23_s16, %s4464_s1  ;;  %p4470_p13 = scmp.lt.s32.totalorder %s4464_s1, %s4464_s1 }
  0x1f   :  { %p4471_p0 = por %p4470_p13, %p4469_p12 }
  0x21   :  { %p4472_p1 = pnand %p4471_p0, %p4465_p11 }
  0x23   :  { %4475 = shalt.err (!%p4472_p1)
}
  0x24   :  { %25 = dma.hbm_to_vmem [thread:$0]  %s4705_s0, 1024, %s23_s16, [#allocation3]  }
  0x25   :  { %s4476_s30 = scalar_lea.hbm %s4708_s3, 16384 }
  0x26   :  { %p4477_p2 = scmp.ne.s32.totalorder %s4708_s3, %s4476_s30  ;;  %p4480_p3 = scmp.lt.u32.totalorder %s4476_s30, %s4708_s3 }
  0x28   :  { %p4482_p4 = pnand %p4480_p3, %p4477_p2 }
  0x2a   :  { %4485 = shalt.err (!%p4482_p4)
}
  0x2b   :  { %s4486_s14 = scalar_lea.vmem %s46_s18, 16384  ;;  %p4491_p6 = scmp.lt.s32.totalorder %s46_s18, %s46_s18 }
  0x2c   :  { %p4487_p5 = scmp.ne.s32.totalorder %s46_s18, %s4486_s14  ;;  %p4492_p7 = scmp.lt.s32.totalorder %s4486_s14, %s4486_s14 }
  0x2e   :  { %p4493_p8 = por %p4492_p7, %p4491_p6 }
  0x30   :  { %p4494_p9 = pnand %p4493_p8, %p4487_p5 }
  0x32   :  { %4497 = shalt.err (!%p4494_p9)
}
  0x33   :  { %51 = dma.hbm_to_vmem [thread:$0]  %s4708_s3, 16384, %s46_s18, [#allocation6], %s4551_s11, %s4551_s11, %s4552_s12  }
  0x34   :  { %s4555_s16 = smov [#allocation8]   ;;  %s4498_s21 = scalar_lea.hbm %s4710_s5, 4096 }
  0x35   :  { %s59_s17 = sshll.u32 %s4555_s16, 4  ;;  %p4499_p10 = scmp.ne.s32.totalorder %s4710_s5, %s4498_s21  ;;  %s60_s17 = int_to_ptr.vmem [resolvable:$true] %s59_s17 }
  0x36   :  { %p4502_p11 = scmp.lt.u32.totalorder %s4498_s21, %s4710_s5 }
  0x38   :  { %p4504_p12 = pnand %p4502_p11, %p4499_p10 }
  0x3a   :  { %4507 = shalt.err (!%p4504_p12)
}
  0x3b   :  { %s4508_s1 = scalar_lea.vmem %s60_s17, 4096  ;;  %p4513_p0 = scmp.lt.s32.totalorder %s60_s17, %s60_s17 }
  0x3c   :  { %p4509_p13 = scmp.ne.s32.totalorder %s60_s17, %s4508_s1  ;;  %p4514_p1 = scmp.lt.s32.totalorder %s4508_s1, %s4508_s1 }
  0x3e   :  { %p4515_p2 = por %p4514_p1, %p4513_p0 }
  0x40   :  { %p4516_p3 = pnand %p4515_p2, %p4509_p13 }
  0x42   :  { %4519 = shalt.err (!%p4516_p3)
}
  0x43   :  { %s4556_s3 = smov 64   ;;  %s4557_s11 = smov 4  }
  0x44   :  { %65 = dma.hbm_to_vmem [thread:$0]  %s4710_s5, 4096, %s60_s17, [#allocation9], %s4556_s3, %s4556_s3, %s4557_s11  }
  0x45   :  { %4542 = dma.done.wait [#allocation3], 1024  }
  0x46   :  { %4543 = vsyncadd [#allocation3], 4294966272 }
  0x47   :  { %4544 = dma.done.wait [#allocation6], 49152  }
  0x48   :  { %4545 = vsyncadd [#allocation6], 4294918144 }
  0x49   :  { %4546 = dma.done.wait [#allocation9], 4096  }
  0x4a   :  { %4547 = vsyncadd [#allocation9], 4294963200  ;;  %v3824_v0 = vld [vmem:[#allocation5 + $0x4] ss:$16 sps:$4 sm:$0xff]   ;;  %v3826_v1 = vld [vmem:[#allocation5 + $0xc] ss:$16 sps:$4 sm:$0xff]  }
  0x4b   :  { %1655 = vmatprep.subr.bf16.mxu0 %v3824_v0  ;;  %v3828_v2 = vld [vmem:[#allocation5] ss:$16 sps:$4 sm:$0xff]   ;;  %v3829_v3 = vld [vmem:[#allocation5 + $0x8] ss:$16 sps:$4 sm:$0xff]   ;;  %1819 = vmatprep.subr.bf16.mxu1 %v3826_v1  ;;  %v3830_v4 = vld [vmem:[#allocation5 + $0x24] ss:$16 sps:$4 sm:$0xff]  }
  0x4c   :  { %1656 = vmatpush1.bf16.msra.mxu0 %v3828_v2  ;;  %1820 = vmatpush1.bf16.msra.mxu1 %v3829_v3  ;;  %v3832_v5 = vld [vmem:[#allocation5 + $0x2c] ss:$16 sps:$4 sm:$0xff]   ;;  %v3834_v6 = vld [vmem:[#allocation5 + $0x20] ss:$16 sps:$4 sm:$0xff]   ;;  %v3835_v7 = vld [vmem:[#allocation5 + $0x28] ss:$16 sps:$4 sm:$0xff]  }
  0x4d   :  { %1657 = vmatprep.subr.bf16.mxu0 %v3830_v4  ;;  %1821 = vmatprep.subr.bf16.mxu1 %v3832_v5  ;;  %v3836_v8 = vld [vmem:[#allocation5 + $0x44] ss:$16 sps:$4 sm:$0xff]   ;;  %v3838_v9 = vld [vmem:[#allocation5 + $0x4c] ss:$16 sps:$4 sm:$0xff]   ;;  %v3840_v10 = vld [vmem:[#allocation5 + $0x40] ss:$16 sps:$4 sm:$0xff]  }
  0x4e   :  { %v3841_v11 = vld [vmem:[#allocation5 + $0x48] ss:$16 sps:$4 sm:$0xff]   ;;  %v3842_v12 = vld [vmem:[#allocation5 + $0x64] ss:$16 sps:$4 sm:$0xff]   ;;  %v3844_v13 = vld [vmem:[#allocation5 + $0x6c] ss:$16 sps:$4 sm:$0xff]  }
  0x4f   :  { %v3846_v14 = vld [vmem:[#allocation5 + $0x60] ss:$16 sps:$4 sm:$0xff]   ;;  %v3847_v15 = vld [vmem:[#allocation5 + $0x68] ss:$16 sps:$4 sm:$0xff]   ;;  %v3848_v16 = vld [vmem:[#allocation5 + $0x84] ss:$16 sps:$4 sm:$0xff]  }
  0x50   :  { %1658 = vmatpush1.bf16.msra.mxu0 %v3834_v6  ;;  %1822 = vmatpush1.bf16.msra.mxu1 %v3835_v7  ;;  %v3850_v17 = vld [vmem:[#allocation5 + $0x8c] ss:$16 sps:$4 sm:$0xff]   ;;  %v3852_v18 = vld [vmem:[#allocation5 + $0x80] ss:$16 sps:$4 sm:$0xff]   ;;  %v3853_v19 = vld [vmem:[#allocation5 + $0x88] ss:$16 sps:$4 sm:$0xff]  }
  0x51   :  { %1659 = vmatprep.subr.bf16.mxu0 %v3836_v8  ;;  %1823 = vmatprep.subr.bf16.mxu1 %v3838_v9  ;;  %v3854_v20 = vld [vmem:[#allocation5 + $0xa4] ss:$16 sps:$4 sm:$0xff]   ;;  %v3856_v21 = vld [vmem:[#allocation5 + $0xac] ss:$16 sps:$4 sm:$0xff]   ;;  %v3858_v22 = vld [vmem:[#allocation5 + $0xa0] ss:$16 sps:$4 sm:$0xff]  }
  0x52   :  { %v3859_v23 = vld [vmem:[#allocation5 + $0xa8] ss:$16 sps:$4 sm:$0xff]   ;;  %v3860_v24 = vld [vmem:[#allocation5 + $0xc4] ss:$16 sps:$4 sm:$0xff]   ;;  %v3862_v25 = vld [vmem:[#allocation5 + $0xcc] ss:$16 sps:$4 sm:$0xff]  }
  0x53   :  { %v3864_v26 = vld [vmem:[#allocation5 + $0xc0] ss:$16 sps:$4 sm:$0xff]   ;;  %v3865_v27 = vld [vmem:[#allocation5 + $0xc8] ss:$16 sps:$4 sm:$0xff]   ;;  %v3866_v28 = vld [vmem:[#allocation5 + $0xe4] ss:$16 sps:$4 sm:$0xff]  }
  0x54   :  { %1660 = vmatpush1.bf16.msra.mxu0 %v3840_v10  ;;  %1824 = vmatpush1.bf16.msra.mxu1 %v3841_v11  ;;  %v3868_v29 = vld [vmem:[#allocation5 + $0xec] ss:$16 sps:$4 sm:$0xff]   ;;  %v3870_v30 = vld [vmem:[#allocation5 + $0xe0] ss:$16 sps:$4 sm:$0xff]   ;;  %v3871_v31 = vld [vmem:[#allocation5 + $0xe8] ss:$16 sps:$4 sm:$0xff]  }
  0x55   :  { %1661 = vmatprep.subr.bf16.mxu0 %v3842_v12  ;;  %1825 = vmatprep.subr.bf16.mxu1 %v3844_v13  ;;  %v3872_v32 = vld [vmem:[#allocation5 + $0x104] ss:$16 sps:$4 sm:$0xff]   ;;  %v3874_v33 = vld [vmem:[#allocation5 + $0x10c] ss:$16 sps:$4 sm:$0xff]   ;;  %v3876_v34 = vld [vmem:[#allocation5 + $0x100] ss:$16 sps:$4 sm:$0xff]  }
  0x56   :  { %v3877_v35 = vld [vmem:[#allocation5 + $0x108] ss:$16 sps:$4 sm:$0xff]   ;;  %v3878_v36 = vld [vmem:[#allocation5 + $0x124] ss:$16 sps:$4 sm:$0xff]   ;;  %v3880_v37 = vld [vmem:[#allocation5 + $0x12c] ss:$16 sps:$4 sm:$0xff]  }
  0x57   :  { %v3882_v38 = vld [vmem:[#allocation5 + $0x120] ss:$16 sps:$4 sm:$0xff]   ;;  %v3883_v39 = vld [vmem:[#allocation5 + $0x128] ss:$16 sps:$4 sm:$0xff]   ;;  %v3884_v40 = vld [vmem:[#allocation5 + $0x144] ss:$16 sps:$4 sm:$0xff]  }
  0x58   :  { %1662 = vmatpush1.bf16.msra.mxu0 %v3846_v14  ;;  %1826 = vmatpush1.bf16.msra.mxu1 %v3847_v15  ;;  %v3886_v41 = vld [vmem:[#allocation5 + $0x14c] ss:$16 sps:$4 sm:$0xff]   ;;  %v3888_v42 = vld [vmem:[#allocation5 + $0x140] ss:$16 sps:$4 sm:$0xff]   ;;  %v3889_v43 = vld [vmem:[#allocation5 + $0x148] ss:$16 sps:$4 sm:$0xff]  }
  0x59   :  { %1663 = vmatprep.subr.bf16.mxu0 %v3848_v16  ;;  %1827 = vmatprep.subr.bf16.mxu1 %v3850_v17  ;;  %v3890_v44 = vld [vmem:[#allocation5 + $0x164] ss:$16 sps:$4 sm:$0xff]   ;;  %v3892_v45 = vld [vmem:[#allocation5 + $0x16c] ss:$16 sps:$4 sm:$0xff]   ;;  %v3894_v47 = vld [vmem:[#allocation5 + $0x160] ss:$16 sps:$4 sm:$0xff]  }
  0x5a   :  { %v82_v46 = vld [vmem:[#allocation2 + $0x8] sm:$0xff]  ;;  %v3896_v50 = vld [vmem:[#allocation5 + $0x184] ss:$16 sps:$4 sm:$0xff]   ;;  %v3900_v52 = vld [vmem:[#allocation5 + $0x180] ss:$16 sps:$4 sm:$0xff]   ;;  %s4558_s29 = smov [#allocation10]  }
  0x5b   :  { %v90_v48 = vpack.c.bf16 %v82_v46, %v82_v46  ;;  %v3895_v49 = vld [vmem:[#allocation5 + $0x168] ss:$16 sps:$4 sm:$0xff]   ;;  %v3898_v51 = vld [vmem:[#allocation5 + $0x18c] ss:$16 sps:$4 sm:$0xff]   ;;  %v3902_v54 = vld [vmem:[#allocation5 + $0x1a4] ss:$16 sps:$4 sm:$0xff]  }
  0x5c   :  { %1664 = vmatpush1.bf16.msra.mxu0 %v3852_v18  ;;  %1828 = vmatpush1.bf16.msra.mxu1 %v3853_v19  ;;  %v3901_v53 = vld [vmem:[#allocation5 + $0x188] ss:$16 sps:$4 sm:$0xff]   ;;  %v3904_v55 = vld [vmem:[#allocation5 + $0x1ac] ss:$16 sps:$4 sm:$0xff]   ;;  %v3906_v56 = vld [vmem:[#allocation5 + $0x1a0] ss:$16 sps:$4 sm:$0xff]  }
  0x5d   :  { %1665 = vmatprep.subr.bf16.mxu0 %v3854_v20  ;;  %1829 = vmatprep.subr.bf16.mxu1 %v3856_v21  ;;  %v3907_v57 = vld [vmem:[#allocation5 + $0x1a8] ss:$16 sps:$4 sm:$0xff]   ;;  %v3908_v58 = vld [vmem:[#allocation5 + $0x1c4] ss:$16 sps:$4 sm:$0xff]   ;;  %v3910_v59 = vld [vmem:[#allocation5 + $0x1cc] ss:$16 sps:$4 sm:$0xff]  }
  0x5e   :  { %1687 = vmatprep.mubr.bf16.mxu0 %v90_v48  ;;  %1851 = vmatprep.mubr.bf16.mxu1 %v90_v48  ;;  %v3912_v60 = vld [vmem:[#allocation5 + $0x1c0] ss:$16 sps:$4 sm:$0xff]   ;;  %v3913_v61 = vld [vmem:[#allocation5 + $0x1c8] ss:$16 sps:$4 sm:$0xff]   ;;  %v3914_v62 = vld [vmem:[#allocation5 + $0x1e4] ss:$16 sps:$4 sm:$0xff]  }
  0x5f   :  { %v3916_v63 = vld [vmem:[#allocation5 + $0x1ec] ss:$16 sps:$4 sm:$0xff]   ;;  %v3918_v0 = vld [vmem:[#allocation5 + $0x1e0] ss:$16 sps:$4 sm:$0xff]   ;;  %v3919_v1 = vld [vmem:[#allocation5 + $0x1e8] ss:$16 sps:$4 sm:$0xff]  }
  0x60   :  { %1666 = vmatpush1.bf16.msra.mxu0 %v3858_v22  ;;  %1830 = vmatpush1.bf16.msra.mxu1 %v3859_v23  ;;  %v81_v2 = vld [vmem:[#allocation2] sm:$0xff]  ;;  %v3925_v4 = vld [vmem:[#allocation5 + $0x20c] ss:$16 sps:$4 sm:$0xff]   ;;  %v3923_v7 = vld [vmem:[#allocation5 + $0x208] ss:$16 sps:$4 sm:$0xff]   ;;  %s3303_s30 = sshll.u32 %s4558_s29, 4  ;;  %s3304_s30 = int_to_ptr.vmem [resolvable:$true] %s3303_s30 }
  0x61   :  { %1667 = vmatprep.subr.bf16.mxu0 %v3860_v24  ;;  %1831 = vmatprep.subr.bf16.mxu1 %v3862_v25  ;;  %v3922_v3 = vld [vmem:[#allocation5 + $0x204] ss:$16 sps:$4 sm:$0xff]   ;;  %v89_v5 = vpack.c.bf16 %v81_v2, %v81_v2  ;;  %v3920_v6 = vld [vmem:[#allocation5 + $0x200] ss:$16 sps:$4 sm:$0xff]   ;;  %v3931_v9 = vld [vmem:[#allocation5 + $0x22c] ss:$16 sps:$4 sm:$0xff]   ;;  %p4525_p5 = scmp.lt.s32.totalorder %s3304_s30, %s3304_s30 }
  0x62   :  { %v3928_v8 = vld [vmem:[#allocation5 + $0x224] ss:$16 sps:$4 sm:$0xff]   ;;  %v3926_v10 = vld [vmem:[#allocation5 + $0x220] ss:$16 sps:$4 sm:$0xff]   ;;  %v3929_v11 = vld [vmem:[#allocation5 + $0x228] ss:$16 sps:$4 sm:$0xff]  }
  0x63   :  { %v3934_v12 = vld [vmem:[#allocation5 + $0x244] ss:$16 sps:$4 sm:$0xff]   ;;  %v3937_v13 = vld [vmem:[#allocation5 + $0x24c] ss:$16 sps:$4 sm:$0xff]   ;;  %v3932_v14 = vld [vmem:[#allocation5 + $0x240] ss:$16 sps:$4 sm:$0xff]  }
  0x64   :  { %1668 = vmatpush1.bf16.msra.mxu0 %v3864_v26  ;;  %1832 = vmatpush1.bf16.msra.mxu1 %v3865_v27  ;;  %v3935_v15 = vld [vmem:[#allocation5 + $0x248] ss:$16 sps:$4 sm:$0xff]   ;;  %v3940_v16 = vld [vmem:[#allocation5 + $0x264] ss:$16 sps:$4 sm:$0xff]   ;;  %v3943_v17 = vld [vmem:[#allocation5 + $0x26c] ss:$16 sps:$4 sm:$0xff]  }
  0x65   :  { %1669 = vmatprep.subr.bf16.mxu0 %v3866_v28  ;;  %1833 = vmatprep.subr.bf16.mxu1 %v3868_v29  ;;  %v3938_v18 = vld [vmem:[#allocation5 + $0x260] ss:$16 sps:$4 sm:$0xff]   ;;  %v3941_v19 = vld [vmem:[#allocation5 + $0x268] ss:$16 sps:$4 sm:$0xff]   ;;  %v3946_v20 = vld [vmem:[#allocation5 + $0x284] ss:$16 sps:$4 sm:$0xff]  }
  0x66   :  { %v3949_v21 = vld [vmem:[#allocation5 + $0x28c] ss:$16 sps:$4 sm:$0xff]   ;;  %v3944_v22 = vld [vmem:[#allocation5 + $0x280] ss:$16 sps:$4 sm:$0xff]   ;;  %v3947_v23 = vld [vmem:[#allocation5 + $0x288] ss:$16 sps:$4 sm:$0xff]  }
  0x67   :  { %v3952_v24 = vld [vmem:[#allocation5 + $0x2a4] ss:$16 sps:$4 sm:$0xff]   ;;  %v3955_v25 = vld [vmem:[#allocation5 + $0x2ac] ss:$16 sps:$4 sm:$0xff]   ;;  %v3950_v26 = vld [vmem:[#allocation5 + $0x2a0] ss:$16 sps:$4 sm:$0xff]  }
  0x68   :  { %1670 = vmatpush1.bf16.msra.mxu0 %v3870_v30  ;;  %1834 = vmatpush1.bf16.msra.mxu1 %v3871_v31  ;;  %v3953_v27 = vld [vmem:[#allocation5 + $0x2a8] ss:$16 sps:$4 sm:$0xff]   ;;  %v3958_v28 = vld [vmem:[#allocation5 + $0x2c4] ss:$16 sps:$4 sm:$0xff]   ;;  %v3961_v29 = vld [vmem:[#allocation5 + $0x2cc] ss:$16 sps:$4 sm:$0xff]  }
  0x69   :  { %1671 = vmatprep.subr.bf16.mxu0 %v3872_v32  ;;  %1835 = vmatprep.subr.bf16.mxu1 %v3874_v33  ;;  %v84_v30 = vld [vmem:[#allocation2 + $0x18] sm:$0xff]  ;;  %v3956_v31 = vld [vmem:[#allocation5 + $0x2c0] ss:$16 sps:$4 sm:$0xff]   ;;  %v3982_v46 = vld [vmem:[#allocation5 + $0x344] ss:$16 sps:$4 sm:$0xff]   ;;  %s4520_s8 = scalar_lea.vmem %s3304_s30, 128 }
  0x6a   :  { %v92_v32 = vpack.c.bf16 %v84_v30, %v84_v30  ;;  %v3959_v33 = vld [vmem:[#allocation5 + $0x2c8] ss:$16 sps:$4 sm:$0xff]   ;;  %v3980_v48 = vld [vmem:[#allocation5 + $0x340] ss:$16 sps:$4 sm:$0xff]   ;;  %v4012_v2 = vld [vmem:[#allocation5 + $0x3e4] ss:$16 sps:$4 sm:$0xff]   ;;  %p4521_p4 = scmp.ne.s32.totalorder %s3304_s30, %s4520_s8  ;;  %p4526_p6 = scmp.lt.s32.totalorder %s4520_s8, %s4520_s8 }
  0x6b   :  { %v4048_v30 = vld [vmem:[#allocation5 + $0x4a4] ss:$16 sps:$4 sm:$0xff]  }
  0x6c   :  { %1672 = vmatpush1.bf16.msra.mxu0 %v3876_v34  ;;  %1836 = vmatpush1.bf16.msra.mxu1 %v3877_v35  ;;  %v3964_v34 = vld [vmem:[#allocation5 + $0x2e4] ss:$16 sps:$4 sm:$0xff]   ;;  %v3967_v35 = vld [vmem:[#allocation5 + $0x2ec] ss:$16 sps:$4 sm:$0xff]   ;;  %p4527_p7 = por %p4526_p6, %p4525_p5 }
  0x6d   :  { %1673 = vmatprep.subr.bf16.mxu0 %v3878_v36  ;;  %1837 = vmatprep.subr.bf16.mxu1 %v3880_v37  ;;  %v3962_v36 = vld [vmem:[#allocation5 + $0x2e0] ss:$16 sps:$4 sm:$0xff]   ;;  %v3965_v37 = vld [vmem:[#allocation5 + $0x2e8] ss:$16 sps:$4 sm:$0xff]  }
  0x6e   :  { %p4528_p8 = pnand %p4527_p7, %p4521_p4 }
  0x70   :  { %1674 = vmatpush1.bf16.msra.mxu0 %v3882_v38  ;;  %1838 = vmatpush1.bf16.msra.mxu1 %v3883_v39  ;;  %v3970_v38 = vld [vmem:[#allocation5 + $0x304] ss:$16 sps:$4 sm:$0xff]   ;;  %v3973_v39 = vld [vmem:[#allocation5 + $0x30c] ss:$16 sps:$4 sm:$0xff]  }
  0x71   :  { %1675 = vmatprep.subr.bf16.mxu0 %v3884_v40  ;;  %1839 = vmatprep.subr.bf16.mxu1 %v3886_v41  ;;  %v3968_v40 = vld [vmem:[#allocation5 + $0x300] ss:$16 sps:$4 sm:$0xff]   ;;  %v3971_v41 = vld [vmem:[#allocation5 + $0x308] ss:$16 sps:$4 sm:$0xff]  }
  0x74   :  { %1676 = vmatpush1.bf16.msra.mxu0 %v3888_v42  ;;  %1840 = vmatpush1.bf16.msra.mxu1 %v3889_v43  ;;  %v3976_v42 = vld [vmem:[#allocation5 + $0x324] ss:$16 sps:$4 sm:$0xff]   ;;  %v3979_v43 = vld [vmem:[#allocation5 + $0x32c] ss:$16 sps:$4 sm:$0xff]  }
  0x75   :  { %1677 = vmatprep.subr.bf16.mxu0 %v3890_v44  ;;  %1841 = vmatprep.subr.bf16.mxu1 %v3892_v45  ;;  %v3974_v44 = vld [vmem:[#allocation5 + $0x320] ss:$16 sps:$4 sm:$0xff]   ;;  %v3977_v45 = vld [vmem:[#allocation5 + $0x328] ss:$16 sps:$4 sm:$0xff]  }
  0x78   :  { %1678 = vmatpush1.bf16.msra.mxu0 %v3894_v47  ;;  %1842 = vmatpush1.bf16.msra.mxu1 %v3895_v49  ;;  %v3985_v47 = vld [vmem:[#allocation5 + $0x34c] ss:$16 sps:$4 sm:$0xff]   ;;  %v3983_v49 = vld [vmem:[#allocation5 + $0x348] ss:$16 sps:$4 sm:$0xff]  }
  0x79   :  { %1679 = vmatprep.subr.bf16.mxu0 %v3896_v50  ;;  %1843 = vmatprep.subr.bf16.mxu1 %v3898_v51  ;;  %v3988_v50 = vld [vmem:[#allocation5 + $0x364] ss:$16 sps:$4 sm:$0xff]   ;;  %v3991_v51 = vld [vmem:[#allocation5 + $0x36c] ss:$16 sps:$4 sm:$0xff]  }
  0x7c   :  { %1680 = vmatpush1.bf16.msra.mxu0 %v3900_v52  ;;  %1844 = vmatpush1.bf16.msra.mxu1 %v3901_v53  ;;  %v3986_v52 = vld [vmem:[#allocation5 + $0x360] ss:$16 sps:$4 sm:$0xff]   ;;  %v3989_v53 = vld [vmem:[#allocation5 + $0x368] ss:$16 sps:$4 sm:$0xff]  }
  0x7d   :  { %1681 = vmatprep.subr.bf16.mxu0 %v3902_v54  ;;  %1845 = vmatprep.subr.bf16.mxu1 %v3904_v55  ;;  %v3994_v54 = vld [vmem:[#allocation5 + $0x384] ss:$16 sps:$4 sm:$0xff]   ;;  %v3997_v55 = vld [vmem:[#allocation5 + $0x38c] ss:$16 sps:$4 sm:$0xff]  }
  0x80   :  { %1682 = vmatpush1.bf16.msra.mxu0 %v3906_v56  ;;  %1846 = vmatpush1.bf16.msra.mxu1 %v3907_v57  ;;  %v3992_v56 = vld [vmem:[#allocation5 + $0x380] ss:$16 sps:$4 sm:$0xff]   ;;  %v3995_v57 = vld [vmem:[#allocation5 + $0x388] ss:$16 sps:$4 sm:$0xff]  }
  0x81   :  { %1683 = vmatprep.subr.bf16.mxu0 %v3908_v58  ;;  %1847 = vmatprep.subr.bf16.mxu1 %v3910_v59  ;;  %v4000_v58 = vld [vmem:[#allocation5 + $0x3a4] ss:$16 sps:$4 sm:$0xff]   ;;  %v4003_v59 = vld [vmem:[#allocation5 + $0x3ac] ss:$16 sps:$4 sm:$0xff]  }
  0x84   :  { %1684 = vmatpush1.bf16.msra.mxu0 %v3912_v60  ;;  %1848 = vmatpush1.bf16.msra.mxu1 %v3913_v61  ;;  %v3998_v60 = vld [vmem:[#allocation5 + $0x3a0] ss:$16 sps:$4 sm:$0xff]   ;;  %v4001_v61 = vld [vmem:[#allocation5 + $0x3a8] ss:$16 sps:$4 sm:$0xff]  }
  0x85   :  { %1685 = vmatprep.subr.bf16.mxu0 %v3914_v62  ;;  %1849 = vmatprep.subr.bf16.mxu1 %v3916_v63  ;;  %v4006_v62 = vld [vmem:[#allocation5 + $0x3c4] ss:$16 sps:$4 sm:$0xff]   ;;  %v4009_v63 = vld [vmem:[#allocation5 + $0x3cc] ss:$16 sps:$4 sm:$0xff]  }
  0x88   :  { %1686 = vmatpush1.bf16.msra.mxu0 %v3918_v0  ;;  %1850 = vmatpush1.bf16.msra.mxu1 %v3919_v1  ;;  %v4004_v0 = vld [vmem:[#allocation5 + $0x3c0] ss:$16 sps:$4 sm:$0xff]   ;;  %v4007_v1 = vld [vmem:[#allocation5 + $0x3c8] ss:$16 sps:$4 sm:$0xff]  }
  0x89   :  { %1696 = vmatprep.subr.bf16.mxu0 %v3922_v3  ;;  %1860 = vmatprep.subr.bf16.mxu1 %v3925_v4  ;;  %v4015_v3 = vld [vmem:[#allocation5 + $0x3ec] ss:$16 sps:$4 sm:$0xff]   ;;  %v4010_v4 = vld [vmem:[#allocation5 + $0x3e0] ss:$16 sps:$4 sm:$0xff]  }
  0x8b   :  { %1688 = vmatmul.mubr.bf16.vlgmr.msra.gmra.mrb[0].mxu0 %v89_v5  ;;  %1852 = vmatmul.mubr.bf16.vlgmr.msra.gmra.mrb[0].mxu1 %v89_v5  ;;  %v4013_v5 = vld [vmem:[#allocation5 + $0x3e8] ss:$16 sps:$4 sm:$0xff]  }
  0x8c   :  { %1697 = vmatpush1.bf16.msra.mxu0 %v3920_v6  ;;  %1861 = vmatpush1.bf16.msra.mxu1 %v3923_v7  ;;  %v4018_v6 = vld [vmem:[#allocation5 + $0x404] ss:$16 sps:$4 sm:$0xff]  }
  0x8d   :  { %1698 = vmatprep.subr.bf16.mxu0 %v3928_v8  ;;  %1862 = vmatprep.subr.bf16.mxu1 %v3931_v9  ;;  %v83_v7 = vld [vmem:[#allocation2 + $0x10] sm:$0xff]  ;;  %v4021_v8 = vld [vmem:[#allocation5 + $0x40c] ss:$16 sps:$4 sm:$0xff]  }
  0x8e   :  { %1728 = vmatprep.mubr.bf16.mxu0 %v92_v32  ;;  %1892 = vmatprep.mubr.bf16.mxu1 %v92_v32  ;;  %v4016_v9 = vld [vmem:[#allocation5 + $0x400] ss:$16 sps:$4 sm:$0xff]  }
  0x8f   :  { %v4046_v32 = vld [vmem:[#allocation5 + $0x4a0] ss:$16 sps:$4 sm:$0xff]  }
  0x90   :  { %1699 = vmatpush1.bf16.msra.mxu0 %v3926_v10  ;;  %1863 = vmatpush1.bf16.msra.mxu1 %v3929_v11  ;;  %v4019_v10 = vld [vmem:[#allocation5 + $0x408] ss:$16 sps:$4 sm:$0xff]   ;;  %v91_v11 = vpack.c.bf16 %v83_v7, %v83_v7  ;;  %v4111_v7 = vld [vmem:[#allocation5 + $0x5ec] ss:$16 sps:$4 sm:$0xff]  }
  0x91   :  { %1700 = vmatprep.subr.bf16.mxu0 %v3934_v12  ;;  %1864 = vmatprep.subr.bf16.mxu1 %v3937_v13  ;;  %v4024_v12 = vld [vmem:[#allocation5 + $0x424] ss:$16 sps:$4 sm:$0xff]   ;;  %v4027_v13 = vld [vmem:[#allocation5 + $0x42c] ss:$16 sps:$4 sm:$0xff]  }
  0x94   :  { %1701 = vmatpush1.bf16.msra.mxu0 %v3932_v14  ;;  %1865 = vmatpush1.bf16.msra.mxu1 %v3935_v15  ;;  %v86_v14 = vld [vmem:[#allocation2 + $0x28] sm:$0xff] }
  0x95   :  { %1702 = vmatprep.subr.bf16.mxu0 %v3940_v16  ;;  %1866 = vmatprep.subr.bf16.mxu1 %v3943_v17  ;;  %v94_v15 = vpack.c.bf16 %v86_v14, %v86_v14  ;;  %v4022_v16 = vld [vmem:[#allocation5 + $0x420] ss:$16 sps:$4 sm:$0xff]   ;;  %v4025_v17 = vld [vmem:[#allocation5 + $0x428] ss:$16 sps:$4 sm:$0xff]  }
  0x96   :  { %v4115_v14 = vld [vmem:[#allocation5 + $0x608] ss:$16 sps:$4 sm:$0xff]  }
  0x98   :  { %1703 = vmatpush1.bf16.msra.mxu0 %v3938_v18  ;;  %1867 = vmatpush1.bf16.msra.mxu1 %v3941_v19  ;;  %v4030_v18 = vld [vmem:[#allocation5 + $0x444] ss:$16 sps:$4 sm:$0xff]   ;;  %v4033_v19 = vld [vmem:[#allocation5 + $0x44c] ss:$16 sps:$4 sm:$0xff]  }
  0x99   :  { %1704 = vmatprep.subr.bf16.mxu0 %v3946_v20  ;;  %1868 = vmatprep.subr.bf16.mxu1 %v3949_v21  ;;  %v4028_v20 = vld [vmem:[#allocation5 + $0x440] ss:$16 sps:$4 sm:$0xff]   ;;  %v4031_v21 = vld [vmem:[#allocation5 + $0x448] ss:$16 sps:$4 sm:$0xff]  }
  0x9c   :  { %1705 = vmatpush1.bf16.msra.mxu0 %v3944_v22  ;;  %1869 = vmatpush1.bf16.msra.mxu1 %v3947_v23  ;;  %v4036_v22 = vld [vmem:[#allocation5 + $0x464] ss:$16 sps:$4 sm:$0xff]   ;;  %v4039_v23 = vld [vmem:[#allocation5 + $0x46c] ss:$16 sps:$4 sm:$0xff]  }
  0x9d   :  { %1706 = vmatprep.subr.bf16.mxu0 %v3952_v24  ;;  %1870 = vmatprep.subr.bf16.mxu1 %v3955_v25  ;;  %v4034_v24 = vld [vmem:[#allocation5 + $0x460] ss:$16 sps:$4 sm:$0xff]   ;;  %v4037_v25 = vld [vmem:[#allocation5 + $0x468] ss:$16 sps:$4 sm:$0xff]  }
  0xa0   :  { %1707 = vmatpush1.bf16.msra.mxu0 %v3950_v26  ;;  %1871 = vmatpush1.bf16.msra.mxu1 %v3953_v27  ;;  %v4042_v26 = vld [vmem:[#allocation5 + $0x484] ss:$16 sps:$4 sm:$0xff]   ;;  %v4045_v27 = vld [vmem:[#allocation5 + $0x48c] ss:$16 sps:$4 sm:$0xff]  }
  0xa1   :  { %1708 = vmatprep.subr.bf16.mxu0 %v3958_v28  ;;  %1872 = vmatprep.subr.bf16.mxu1 %v3961_v29  ;;  %v4040_v28 = vld [vmem:[#allocation5 + $0x480] ss:$16 sps:$4 sm:$0xff]   ;;  %v4043_v29 = vld [vmem:[#allocation5 + $0x488] ss:$16 sps:$4 sm:$0xff]  }
  0xa4   :  { %1709 = vmatpush1.bf16.msra.mxu0 %v3956_v31  ;;  %1873 = vmatpush1.bf16.msra.mxu1 %v3959_v33  ;;  %v4051_v31 = vld [vmem:[#allocation5 + $0x4ac] ss:$16 sps:$4 sm:$0xff]   ;;  %v4049_v33 = vld [vmem:[#allocation5 + $0x4a8] ss:$16 sps:$4 sm:$0xff]  }
  0xa5   :  { %1710 = vmatprep.subr.bf16.mxu0 %v3964_v34  ;;  %1874 = vmatprep.subr.bf16.mxu1 %v3967_v35  ;;  %v4054_v34 = vld [vmem:[#allocation5 + $0x4c4] ss:$16 sps:$4 sm:$0xff]   ;;  %v4057_v35 = vld [vmem:[#allocation5 + $0x4cc] ss:$16 sps:$4 sm:$0xff]  }
  0xa8   :  { %1711 = vmatpush1.bf16.msra.mxu0 %v3962_v36  ;;  %1875 = vmatpush1.bf16.msra.mxu1 %v3965_v37  ;;  %v4052_v36 = vld [vmem:[#allocation5 + $0x4c0] ss:$16 sps:$4 sm:$0xff]   ;;  %v4055_v37 = vld [vmem:[#allocation5 + $0x4c8] ss:$16 sps:$4 sm:$0xff]  }
  0xa9   :  { %1712 = vmatprep.subr.bf16.mxu0 %v3970_v38  ;;  %1876 = vmatprep.subr.bf16.mxu1 %v3973_v39  ;;  %v4060_v38 = vld [vmem:[#allocation5 + $0x4e4] ss:$16 sps:$4 sm:$0xff]   ;;  %v4063_v39 = vld [vmem:[#allocation5 + $0x4ec] ss:$16 sps:$4 sm:$0xff]  }
  0xac   :  { %1713 = vmatpush1.bf16.msra.mxu0 %v3968_v40  ;;  %1877 = vmatpush1.bf16.msra.mxu1 %v3971_v41  ;;  %v4058_v40 = vld [vmem:[#allocation5 + $0x4e0] ss:$16 sps:$4 sm:$0xff]   ;;  %v4061_v41 = vld [vmem:[#allocation5 + $0x4e8] ss:$16 sps:$4 sm:$0xff]  }
  0xad   :  { %1714 = vmatprep.subr.bf16.mxu0 %v3976_v42  ;;  %1878 = vmatprep.subr.bf16.mxu1 %v3979_v43  ;;  %v4066_v42 = vld [vmem:[#allocation5 + $0x504] ss:$16 sps:$4 sm:$0xff]   ;;  %v4069_v43 = vld [vmem:[#allocation5 + $0x50c] ss:$16 sps:$4 sm:$0xff]  }
  0xb0   :  { %1715 = vmatpush1.bf16.msra.mxu0 %v3974_v44  ;;  %1879 = vmatpush1.bf16.msra.mxu1 %v3977_v45  ;;  %v4064_v44 = vld [vmem:[#allocation5 + $0x500] ss:$16 sps:$4 sm:$0xff]   ;;  %v4067_v45 = vld [vmem:[#allocation5 + $0x508] ss:$16 sps:$4 sm:$0xff]  }
  0xb1   :  { %1716 = vmatprep.subr.bf16.mxu0 %v3982_v46  ;;  %1880 = vmatprep.subr.bf16.mxu1 %v3985_v47  ;;  %v4072_v46 = vld [vmem:[#allocation5 + $0x524] ss:$16 sps:$4 sm:$0xff]   ;;  %v4075_v47 = vld [vmem:[#allocation5 + $0x52c] ss:$16 sps:$4 sm:$0xff]  }
  0xb4   :  { %1717 = vmatpush1.bf16.msra.mxu0 %v3980_v48  ;;  %1881 = vmatpush1.bf16.msra.mxu1 %v3983_v49  ;;  %v4070_v48 = vld [vmem:[#allocation5 + $0x520] ss:$16 sps:$4 sm:$0xff]   ;;  %v4073_v49 = vld [vmem:[#allocation5 + $0x528] ss:$16 sps:$4 sm:$0xff]  }
  0xb5   :  { %1718 = vmatprep.subr.bf16.mxu0 %v3988_v50  ;;  %1882 = vmatprep.subr.bf16.mxu1 %v3991_v51  ;;  %v4078_v50 = vld [vmem:[#allocation5 + $0x544] ss:$16 sps:$4 sm:$0xff]   ;;  %v4081_v51 = vld [vmem:[#allocation5 + $0x54c] ss:$16 sps:$4 sm:$0xff]  }
  0xb8   :  { %1719 = vmatpush1.bf16.msra.mxu0 %v3986_v52  ;;  %1883 = vmatpush1.bf16.msra.mxu1 %v3989_v53  ;;  %v4076_v52 = vld [vmem:[#allocation5 + $0x540] ss:$16 sps:$4 sm:$0xff]   ;;  %v4079_v53 = vld [vmem:[#allocation5 + $0x548] ss:$16 sps:$4 sm:$0xff]  }
  0xb9   :  { %1720 = vmatprep.subr.bf16.mxu0 %v3994_v54  ;;  %1884 = vmatprep.subr.bf16.mxu1 %v3997_v55  ;;  %v4084_v54 = vld [vmem:[#allocation5 + $0x564] ss:$16 sps:$4 sm:$0xff]   ;;  %v4087_v55 = vld [vmem:[#allocation5 + $0x56c] ss:$16 sps:$4 sm:$0xff]  }
  0xbc   :  { %1721 = vmatpush1.bf16.msra.mxu0 %v3992_v56  ;;  %1885 = vmatpush1.bf16.msra.mxu1 %v3995_v57  ;;  %v4082_v56 = vld [vmem:[#allocation5 + $0x560] ss:$16 sps:$4 sm:$0xff]   ;;  %v4085_v57 = vld [vmem:[#allocation5 + $0x568] ss:$16 sps:$4 sm:$0xff]  }
  0xbd   :  { %1722 = vmatprep.subr.bf16.mxu0 %v4000_v58  ;;  %1886 = vmatprep.subr.bf16.mxu1 %v4003_v59  ;;  %v4090_v58 = vld [vmem:[#allocation5 + $0x584] ss:$16 sps:$4 sm:$0xff]   ;;  %v4093_v59 = vld [vmem:[#allocation5 + $0x58c] ss:$16 sps:$4 sm:$0xff]  }
  0xc0   :  { %1723 = vmatpush1.bf16.msra.mxu0 %v3998_v60  ;;  %1887 = vmatpush1.bf16.msra.mxu1 %v4001_v61  ;;  %v4088_v60 = vld [vmem:[#allocation5 + $0x580] ss:$16 sps:$4 sm:$0xff]   ;;  %v4091_v61 = vld [vmem:[#allocation5 + $0x588] ss:$16 sps:$4 sm:$0xff]  }
  0xc1   :  { %1724 = vmatprep.subr.bf16.mxu0 %v4006_v62  ;;  %1888 = vmatprep.subr.bf16.mxu1 %v4009_v63  ;;  %v4096_v62 = vld [vmem:[#allocation5 + $0x5a4] ss:$16 sps:$4 sm:$0xff]   ;;  %v4099_v63 = vld [vmem:[#allocation5 + $0x5ac] ss:$16 sps:$4 sm:$0xff]  }
  0xc4   :  { %1725 = vmatpush1.bf16.msra.mxu0 %v4004_v0  ;;  %1889 = vmatpush1.bf16.msra.mxu1 %v4007_v1  ;;  %v4094_v0 = vld [vmem:[#allocation5 + $0x5a0] ss:$16 sps:$4 sm:$0xff]   ;;  %v4097_v1 = vld [vmem:[#allocation5 + $0x5a8] ss:$16 sps:$4 sm:$0xff]  }
  0xc5   :  { %1726 = vmatprep.subr.bf16.mxu0 %v4012_v2  ;;  %1890 = vmatprep.subr.bf16.mxu1 %v4015_v3  ;;  %v4102_v2 = vld [vmem:[#allocation5 + $0x5c4] ss:$16 sps:$4 sm:$0xff]   ;;  %v4105_v3 = vld [vmem:[#allocation5 + $0x5cc] ss:$16 sps:$4 sm:$0xff]  }
  0xc8   :  { %1727 = vmatpush1.bf16.msra.mxu0 %v4010_v4  ;;  %1891 = vmatpush1.bf16.msra.mxu1 %v4013_v5  ;;  %v4100_v4 = vld [vmem:[#allocation5 + $0x5c0] ss:$16 sps:$4 sm:$0xff]   ;;  %v4103_v5 = vld [vmem:[#allocation5 + $0x5c8] ss:$16 sps:$4 sm:$0xff]  }
  0xc9   :  { %1737 = vmatprep.subr.bf16.mxu0 %v4018_v6  ;;  %1901 = vmatprep.subr.bf16.mxu1 %v4021_v8  ;;  %v4108_v6 = vld [vmem:[#allocation5 + $0x5e4] ss:$16 sps:$4 sm:$0xff]   ;;  %v4106_v8 = vld [vmem:[#allocation5 + $0x5e0] ss:$16 sps:$4 sm:$0xff]  }
  0xcb   :  { %1729 = vmatmul.mubr.bf16.vlgmr.msra.gmra.mrb[0].mxu0 %v91_v11  ;;  %1893 = vmatmul.mubr.bf16.vlgmr.msra.gmra.mrb[0].mxu1 %v91_v11  ;;  %v85_v11 = vld [vmem:[#allocation2 + $0x20] sm:$0xff] }
  0xcc   :  { %1738 = vmatpush1.bf16.msra.mxu0 %v4016_v9  ;;  %1902 = vmatpush1.bf16.msra.mxu1 %v4019_v10  ;;  %v4109_v9 = vld [vmem:[#allocation5 + $0x5e8] ss:$16 sps:$4 sm:$0xff]   ;;  %v4114_v10 = vld [vmem:[#allocation5 + $0x604] ss:$16 sps:$4 sm:$0xff]  }
  0xcd   :  { %1739 = vmatprep.subr.bf16.mxu0 %v4024_v12  ;;  %1903 = vmatprep.subr.bf16.mxu1 %v4027_v13  ;;  %v4117_v12 = vld [vmem:[#allocation5 + $0x60c] ss:$16 sps:$4 sm:$0xff]   ;;  %v4112_v13 = vld [vmem:[#allocation5 + $0x600] ss:$16 sps:$4 sm:$0xff]  }
  0xce   :  { %1769 = vmatprep.mubr.bf16.mxu0 %v94_v15  ;;  %1933 = vmatprep.mubr.bf16.mxu1 %v94_v15  ;;  %v93_v15 = vpack.c.bf16 %v85_v11, %v85_v11  ;;  %v4207_v11 = vld [vmem:[#allocation5 + $0x7ec] ss:$16 sps:$4 sm:$0xff]  }
  0xd0   :  { %1740 = vmatpush1.bf16.msra.mxu0 %v4022_v16  ;;  %1904 = vmatpush1.bf16.msra.mxu1 %v4025_v17  ;;  %v88_v16 = vld [vmem:[#allocation2 + $0x38] sm:$0xff]  ;;  %v4120_v17 = vld [vmem:[#allocation5 + $0x624] ss:$16 sps:$4 sm:$0xff]  }
  0xd1   :  { %1741 = vmatprep.subr.bf16.mxu0 %v4030_v18  ;;  %1905 = vmatprep.subr.bf16.mxu1 %v4033_v19  ;;  %v4123_v18 = vld [vmem:[#allocation5 + $0x62c] ss:$16 sps:$4 sm:$0xff]   ;;  %v96_v19 = vpack.c.bf16 %v88_v16, %v88_v16 }
  0xd2   :  { %v4213_v16 = vld [vmem:[#allocation7 + $0xc] ss:$16 sps:$4 sm:$0xff]  }
  0xd4   :  { %1742 = vmatpush1.bf16.msra.mxu0 %v4028_v20  ;;  %1906 = vmatpush1.bf16.msra.mxu1 %v4031_v21  ;;  %v4118_v20 = vld [vmem:[#allocation5 + $0x620] ss:$16 sps:$4 sm:$0xff]   ;;  %v4121_v21 = vld [vmem:[#allocation5 + $0x628] ss:$16 sps:$4 sm:$0xff]  }
  0xd5   :  { %1743 = vmatprep.subr.bf16.mxu0 %v4036_v22  ;;  %1907 = vmatprep.subr.bf16.mxu1 %v4039_v23  ;;  %v4126_v22 = vld [vmem:[#allocation5 + $0x644] ss:$16 sps:$4 sm:$0xff]   ;;  %v4129_v23 = vld [vmem:[#allocation5 + $0x64c] ss:$16 sps:$4 sm:$0xff]  }
  0xd8   :  { %1744 = vmatpush1.bf16.msra.mxu0 %v4034_v24  ;;  %1908 = vmatpush1.bf16.msra.mxu1 %v4037_v25  ;;  %v4124_v24 = vld [vmem:[#allocation5 + $0x640] ss:$16 sps:$4 sm:$0xff]   ;;  %v4127_v25 = vld [vmem:[#allocation5 + $0x648] ss:$16 sps:$4 sm:$0xff]  }
  0xd9   :  { %1745 = vmatprep.subr.bf16.mxu0 %v4042_v26  ;;  %1909 = vmatprep.subr.bf16.mxu1 %v4045_v27  ;;  %v4132_v26 = vld [vmem:[#allocation5 + $0x664] ss:$16 sps:$4 sm:$0xff]   ;;  %v4135_v27 = vld [vmem:[#allocation5 + $0x66c] ss:$16 sps:$4 sm:$0xff]  }
  0xdc   :  { %1746 = vmatpush1.bf16.msra.mxu0 %v4040_v28  ;;  %1910 = vmatpush1.bf16.msra.mxu1 %v4043_v29  ;;  %v4130_v28 = vld [vmem:[#allocation5 + $0x660] ss:$16 sps:$4 sm:$0xff]   ;;  %v4133_v29 = vld [vmem:[#allocation5 + $0x668] ss:$16 sps:$4 sm:$0xff]  }
  0xdd   :  { %1747 = vmatprep.subr.bf16.mxu0 %v4048_v30  ;;  %1911 = vmatprep.subr.bf16.mxu1 %v4051_v31  ;;  %v4138_v30 = vld [vmem:[#allocation5 + $0x684] ss:$16 sps:$4 sm:$0xff]   ;;  %v4141_v31 = vld [vmem:[#allocation5 + $0x68c] ss:$16 sps:$4 sm:$0xff]  }
  0xe0   :  { %1748 = vmatpush1.bf16.msra.mxu0 %v4046_v32  ;;  %1912 = vmatpush1.bf16.msra.mxu1 %v4049_v33  ;;  %v4136_v32 = vld [vmem:[#allocation5 + $0x680] ss:$16 sps:$4 sm:$0xff]   ;;  %v4139_v33 = vld [vmem:[#allocation5 + $0x688] ss:$16 sps:$4 sm:$0xff]  }
  0xe1   :  { %1749 = vmatprep.subr.bf16.mxu0 %v4054_v34  ;;  %1913 = vmatprep.subr.bf16.mxu1 %v4057_v35  ;;  %v4144_v34 = vld [vmem:[#allocation5 + $0x6a4] ss:$16 sps:$4 sm:$0xff]   ;;  %v4147_v35 = vld [vmem:[#allocation5 + $0x6ac] ss:$16 sps:$4 sm:$0xff]  }
  0xe4   :  { %1750 = vmatpush1.bf16.msra.mxu0 %v4052_v36  ;;  %1914 = vmatpush1.bf16.msra.mxu1 %v4055_v37  ;;  %v4142_v36 = vld [vmem:[#allocation5 + $0x6a0] ss:$16 sps:$4 sm:$0xff]   ;;  %v4145_v37 = vld [vmem:[#allocation5 + $0x6a8] ss:$16 sps:$4 sm:$0xff]  }
  0xe5   :  { %1751 = vmatprep.subr.bf16.mxu0 %v4060_v38  ;;  %1915 = vmatprep.subr.bf16.mxu1 %v4063_v39  ;;  %v4150_v38 = vld [vmem:[#allocation5 + $0x6c4] ss:$16 sps:$4 sm:$0xff]   ;;  %v4153_v39 = vld [vmem:[#allocation5 + $0x6cc] ss:$16 sps:$4 sm:$0xff]  }
  0xe8   :  { %1752 = vmatpush1.bf16.msra.mxu0 %v4058_v40  ;;  %1916 = vmatpush1.bf16.msra.mxu1 %v4061_v41  ;;  %v4148_v40 = vld [vmem:[#allocation5 + $0x6c0] ss:$16 sps:$4 sm:$0xff]   ;;  %v4151_v41 = vld [vmem:[#allocation5 + $0x6c8] ss:$16 sps:$4 sm:$0xff]  }
  0xe9   :  { %1753 = vmatprep.subr.bf16.mxu0 %v4066_v42  ;;  %1917 = vmatprep.subr.bf16.mxu1 %v4069_v43  ;;  %v4156_v42 = vld [vmem:[#allocation5 + $0x6e4] ss:$16 sps:$4 sm:$0xff]   ;;  %v4159_v43 = vld [vmem:[#allocation5 + $0x6ec] ss:$16 sps:$4 sm:$0xff]  }
  0xec   :  { %1754 = vmatpush1.bf16.msra.mxu0 %v4064_v44  ;;  %1918 = vmatpush1.bf16.msra.mxu1 %v4067_v45  ;;  %v4154_v44 = vld [vmem:[#allocation5 + $0x6e0] ss:$16 sps:$4 sm:$0xff]   ;;  %v4157_v45 = vld [vmem:[#allocation5 + $0x6e8] ss:$16 sps:$4 sm:$0xff]  }
  0xed   :  { %1755 = vmatprep.subr.bf16.mxu0 %v4072_v46  ;;  %1919 = vmatprep.subr.bf16.mxu1 %v4075_v47  ;;  %v4162_v46 = vld [vmem:[#allocation5 + $0x704] ss:$16 sps:$4 sm:$0xff]   ;;  %v4165_v47 = vld [vmem:[#allocation5 + $0x70c] ss:$16 sps:$4 sm:$0xff]  }
  0xf0   :  { %1756 = vmatpush1.bf16.msra.mxu0 %v4070_v48  ;;  %1920 = vmatpush1.bf16.msra.mxu1 %v4073_v49  ;;  %v4160_v48 = vld [vmem:[#allocation5 + $0x700] ss:$16 sps:$4 sm:$0xff]   ;;  %v4163_v49 = vld [vmem:[#allocation5 + $0x708] ss:$16 sps:$4 sm:$0xff]  }
  0xf1   :  { %1757 = vmatprep.subr.bf16.mxu0 %v4078_v50  ;;  %1921 = vmatprep.subr.bf16.mxu1 %v4081_v51  ;;  %v4168_v50 = vld [vmem:[#allocation5 + $0x724] ss:$16 sps:$4 sm:$0xff]   ;;  %v4171_v51 = vld [vmem:[#allocation5 + $0x72c] ss:$16 sps:$4 sm:$0xff]  }
  0xf4   :  { %1758 = vmatpush1.bf16.msra.mxu0 %v4076_v52  ;;  %1922 = vmatpush1.bf16.msra.mxu1 %v4079_v53  ;;  %v4166_v52 = vld [vmem:[#allocation5 + $0x720] ss:$16 sps:$4 sm:$0xff]   ;;  %v4169_v53 = vld [vmem:[#allocation5 + $0x728] ss:$16 sps:$4 sm:$0xff]  }
  0xf5   :  { %1759 = vmatprep.subr.bf16.mxu0 %v4084_v54  ;;  %1923 = vmatprep.subr.bf16.mxu1 %v4087_v55  ;;  %v4174_v54 = vld [vmem:[#allocation5 + $0x744] ss:$16 sps:$4 sm:$0xff]   ;;  %v4177_v55 = vld [vmem:[#allocation5 + $0x74c] ss:$16 sps:$4 sm:$0xff]  }
  0xf8   :  { %1760 = vmatpush1.bf16.msra.mxu0 %v4082_v56  ;;  %1924 = vmatpush1.bf16.msra.mxu1 %v4085_v57  ;;  %v4172_v56 = vld [vmem:[#allocation5 + $0x740] ss:$16 sps:$4 sm:$0xff]   ;;  %v4175_v57 = vld [vmem:[#allocation5 + $0x748] ss:$16 sps:$4 sm:$0xff]  }
  0xf9   :  { %1761 = vmatprep.subr.bf16.mxu0 %v4090_v58  ;;  %1925 = vmatprep.subr.bf16.mxu1 %v4093_v59  ;;  %v4180_v58 = vld [vmem:[#allocation5 + $0x764] ss:$16 sps:$4 sm:$0xff]   ;;  %v4183_v59 = vld [vmem:[#allocation5 + $0x76c] ss:$16 sps:$4 sm:$0xff]  }
  0xfc   :  { %1762 = vmatpush1.bf16.msra.mxu0 %v4088_v60  ;;  %1926 = vmatpush1.bf16.msra.mxu1 %v4091_v61  ;;  %v4178_v60 = vld [vmem:[#allocation5 + $0x760] ss:$16 sps:$4 sm:$0xff]   ;;  %v4181_v61 = vld [vmem:[#allocation5 + $0x768] ss:$16 sps:$4 sm:$0xff]  }
  0xfd   :  { %1763 = vmatprep.subr.bf16.mxu0 %v4096_v62  ;;  %1927 = vmatprep.subr.bf16.mxu1 %v4099_v63  ;;  %v4186_v62 = vld [vmem:[#allocation5 + $0x784] ss:$16 sps:$4 sm:$0xff]   ;;  %v4189_v63 = vld [vmem:[#allocation5 + $0x78c] ss:$16 sps:$4 sm:$0xff]  }
 0x100   :  { %1764 = vmatpush1.bf16.msra.mxu0 %v4094_v0  ;;  %1928 = vmatpush1.bf16.msra.mxu1 %v4097_v1  ;;  %v4184_v0 = vld [vmem:[#allocation5 + $0x780] ss:$16 sps:$4 sm:$0xff]   ;;  %v4187_v1 = vld [vmem:[#allocation5 + $0x788] ss:$16 sps:$4 sm:$0xff]  }
 0x101   :  { %1765 = vmatprep.subr.bf16.mxu0 %v4102_v2  ;;  %1929 = vmatprep.subr.bf16.mxu1 %v4105_v3  ;;  %v4192_v2 = vld [vmem:[#allocation5 + $0x7a4] ss:$16 sps:$4 sm:$0xff]   ;;  %v4195_v3 = vld [vmem:[#allocation5 + $0x7ac] ss:$16 sps:$4 sm:$0xff]  }
 0x104   :  { %1766 = vmatpush1.bf16.msra.mxu0 %v4100_v4  ;;  %1930 = vmatpush1.bf16.msra.mxu1 %v4103_v5  ;;  %v4190_v4 = vld [vmem:[#allocation5 + $0x7a0] ss:$16 sps:$4 sm:$0xff]   ;;  %v4193_v5 = vld [vmem:[#allocation5 + $0x7a8] ss:$16 sps:$4 sm:$0xff]  }
 0x105   :  { %1767 = vmatprep.subr.bf16.mxu0 %v4108_v6  ;;  %1931 = vmatprep.subr.bf16.mxu1 %v4111_v7  ;;  %v4198_v6 = vld [vmem:[#allocation5 + $0x7c4] ss:$16 sps:$4 sm:$0xff]   ;;  %v4201_v7 = vld [vmem:[#allocation5 + $0x7cc] ss:$16 sps:$4 sm:$0xff]  }
 0x108   :  { %1768 = vmatpush1.bf16.msra.mxu0 %v4106_v8  ;;  %1932 = vmatpush1.bf16.msra.mxu1 %v4109_v9  ;;  %v4196_v8 = vld [vmem:[#allocation5 + $0x7c0] ss:$16 sps:$4 sm:$0xff]   ;;  %v4199_v9 = vld [vmem:[#allocation5 + $0x7c8] ss:$16 sps:$4 sm:$0xff]  }
 0x109   :  { %1778 = vmatprep.subr.bf16.mxu0 %v4114_v10  ;;  %1942 = vmatprep.subr.bf16.mxu1 %v4117_v12  ;;  %v4204_v10 = vld [vmem:[#allocation5 + $0x7e4] ss:$16 sps:$4 sm:$0xff]   ;;  %v4202_v12 = vld [vmem:[#allocation5 + $0x7e0] ss:$16 sps:$4 sm:$0xff]  }
 0x10b   :  { %1770 = vmatmul.mubr.bf16.vlgmr.msra.gmra.mrb[0].mxu0 %v93_v15  ;;  %1934 = vmatmul.mubr.bf16.vlgmr.msra.gmra.mrb[0].mxu1 %v93_v15  ;;  %v4210_v15 = vld [vmem:[#allocation7 + $0x4] ss:$16 sps:$4 sm:$0xff]  }
 0x10c   :  { %1779 = vmatpush1.bf16.msra.mxu0 %v4112_v13  ;;  %1943 = vmatpush1.bf16.msra.mxu1 %v4115_v14  ;;  %v4205_v13 = vld [vmem:[#allocation5 + $0x7e8] ss:$16 sps:$4 sm:$0xff]   ;;  %v87_v14 = vld [vmem:[#allocation2 + $0x30] sm:$0xff] }
 0x10d   :  { %1780 = vmatprep.subr.bf16.mxu0 %v4120_v17  ;;  %1944 = vmatprep.subr.bf16.mxu1 %v4123_v18  ;;  %v95_v17 = vpack.c.bf16 %v87_v14, %v87_v14  ;;  %v4208_v18 = vld [vmem:[#allocation7] ss:$16 sps:$4 sm:$0xff]  }
 0x10e   :  { %1810 = vmatprep.mubr.bf16.mxu0 %v96_v19  ;;  %1974 = vmatprep.mubr.bf16.mxu1 %v96_v19  ;;  %v4211_v19 = vld [vmem:[#allocation7 + $0x8] ss:$16 sps:$4 sm:$0xff]   ;;  %v4298_v14 = vld [vmem:[#allocation7 + $0x1e0] ss:$16 sps:$4 sm:$0xff]  }
 0x110   :  { %1781 = vmatpush1.bf16.msra.mxu0 %v4118_v20  ;;  %1945 = vmatpush1.bf16.msra.mxu1 %v4121_v21  ;;  %v4216_v20 = vld [vmem:[#allocation7 + $0x24] ss:$16 sps:$4 sm:$0xff]   ;;  %v4219_v21 = vld [vmem:[#allocation7 + $0x2c] ss:$16 sps:$4 sm:$0xff]  }
 0x111   :  { %1782 = vmatprep.subr.bf16.mxu0 %v4126_v22  ;;  %1946 = vmatprep.subr.bf16.mxu1 %v4129_v23  ;;  %v4214_v22 = vld [vmem:[#allocation7 + $0x20] ss:$16 sps:$4 sm:$0xff]   ;;  %v4217_v23 = vld [vmem:[#allocation7 + $0x28] ss:$16 sps:$4 sm:$0xff]  }
 0x114   :  { %1783 = vmatpush1.bf16.msra.mxu0 %v4124_v24  ;;  %1947 = vmatpush1.bf16.msra.mxu1 %v4127_v25  ;;  %v4222_v24 = vld [vmem:[#allocation7 + $0x44] ss:$16 sps:$4 sm:$0xff]   ;;  %v4225_v25 = vld [vmem:[#allocation7 + $0x4c] ss:$16 sps:$4 sm:$0xff]  }
 0x115   :  { %1784 = vmatprep.subr.bf16.mxu0 %v4132_v26  ;;  %1948 = vmatprep.subr.bf16.mxu1 %v4135_v27  ;;  %v4220_v26 = vld [vmem:[#allocation7 + $0x40] ss:$16 sps:$4 sm:$0xff]   ;;  %v4223_v27 = vld [vmem:[#allocation7 + $0x48] ss:$16 sps:$4 sm:$0xff]  }
 0x118   :  { %1785 = vmatpush1.bf16.msra.mxu0 %v4130_v28  ;;  %1949 = vmatpush1.bf16.msra.mxu1 %v4133_v29  ;;  %v4228_v28 = vld [vmem:[#allocation7 + $0x64] ss:$16 sps:$4 sm:$0xff]   ;;  %v4231_v29 = vld [vmem:[#allocation7 + $0x6c] ss:$16 sps:$4 sm:$0xff]  }
 0x119   :  { %1786 = vmatprep.subr.bf16.mxu0 %v4138_v30  ;;  %1950 = vmatprep.subr.bf16.mxu1 %v4141_v31  ;;  %v4226_v30 = vld [vmem:[#allocation7 + $0x60] ss:$16 sps:$4 sm:$0xff]   ;;  %v4229_v31 = vld [vmem:[#allocation7 + $0x68] ss:$16 sps:$4 sm:$0xff]  }
 0x11c   :  { %1787 = vmatpush1.bf16.msra.mxu0 %v4136_v32  ;;  %1951 = vmatpush1.bf16.msra.mxu1 %v4139_v33  ;;  %v4234_v32 = vld [vmem:[#allocation7 + $0x84] ss:$16 sps:$4 sm:$0xff]   ;;  %v4237_v33 = vld [vmem:[#allocation7 + $0x8c] ss:$16 sps:$4 sm:$0xff]  }
 0x11d   :  { %1788 = vmatprep.subr.bf16.mxu0 %v4144_v34  ;;  %1952 = vmatprep.subr.bf16.mxu1 %v4147_v35  ;;  %v4232_v34 = vld [vmem:[#allocation7 + $0x80] ss:$16 sps:$4 sm:$0xff]   ;;  %v4235_v35 = vld [vmem:[#allocation7 + $0x88] ss:$16 sps:$4 sm:$0xff]  }
 0x120   :  { %1789 = vmatpush1.bf16.msra.mxu0 %v4142_v36  ;;  %1953 = vmatpush1.bf16.msra.mxu1 %v4145_v37  ;;  %v4240_v36 = vld [vmem:[#allocation7 + $0xa4] ss:$16 sps:$4 sm:$0xff]   ;;  %v4243_v37 = vld [vmem:[#allocation7 + $0xac] ss:$16 sps:$4 sm:$0xff]  }
 0x121   :  { %1790 = vmatprep.subr.bf16.mxu0 %v4150_v38  ;;  %1954 = vmatprep.subr.bf16.mxu1 %v4153_v39  ;;  %v4238_v38 = vld [vmem:[#allocation7 + $0xa0] ss:$16 sps:$4 sm:$0xff]   ;;  %v4241_v39 = vld [vmem:[#allocation7 + $0xa8] ss:$16 sps:$4 sm:$0xff]  }
 0x124   :  { %1791 = vmatpush1.bf16.msra.mxu0 %v4148_v40  ;;  %1955 = vmatpush1.bf16.msra.mxu1 %v4151_v41  ;;  %v4246_v40 = vld [vmem:[#allocation7 + $0xc4] ss:$16 sps:$4 sm:$0xff]   ;;  %v4249_v41 = vld [vmem:[#allocation7 + $0xcc] ss:$16 sps:$4 sm:$0xff]  }
 0x125   :  { %1792 = vmatprep.subr.bf16.mxu0 %v4156_v42  ;;  %1956 = vmatprep.subr.bf16.mxu1 %v4159_v43  ;;  %v4244_v42 = vld [vmem:[#allocation7 + $0xc0] ss:$16 sps:$4 sm:$0xff]   ;;  %v4247_v43 = vld [vmem:[#allocation7 + $0xc8] ss:$16 sps:$4 sm:$0xff]  }
 0x128   :  { %1793 = vmatpush1.bf16.msra.mxu0 %v4154_v44  ;;  %1957 = vmatpush1.bf16.msra.mxu1 %v4157_v45  ;;  %v4252_v44 = vld [vmem:[#allocation7 + $0xe4] ss:$16 sps:$4 sm:$0xff]   ;;  %v4255_v45 = vld [vmem:[#allocation7 + $0xec] ss:$16 sps:$4 sm:$0xff]  }
 0x129   :  { %1794 = vmatprep.subr.bf16.mxu0 %v4162_v46  ;;  %1958 = vmatprep.subr.bf16.mxu1 %v4165_v47  ;;  %v4250_v46 = vld [vmem:[#allocation7 + $0xe0] ss:$16 sps:$4 sm:$0xff]   ;;  %v4253_v47 = vld [vmem:[#allocation7 + $0xe8] ss:$16 sps:$4 sm:$0xff]  }
 0x12c   :  { %1795 = vmatpush1.bf16.msra.mxu0 %v4160_v48  ;;  %1959 = vmatpush1.bf16.msra.mxu1 %v4163_v49  ;;  %v4258_v48 = vld [vmem:[#allocation7 + $0x104] ss:$16 sps:$4 sm:$0xff]   ;;  %v4261_v49 = vld [vmem:[#allocation7 + $0x10c] ss:$16 sps:$4 sm:$0xff]  }
 0x12d   :  { %1796 = vmatprep.subr.bf16.mxu0 %v4168_v50  ;;  %1960 = vmatprep.subr.bf16.mxu1 %v4171_v51  ;;  %v4256_v50 = vld [vmem:[#allocation7 + $0x100] ss:$16 sps:$4 sm:$0xff]   ;;  %v4259_v51 = vld [vmem:[#allocation7 + $0x108] ss:$16 sps:$4 sm:$0xff]  }
 0x130   :  { %1797 = vmatpush1.bf16.msra.mxu0 %v4166_v52  ;;  %1961 = vmatpush1.bf16.msra.mxu1 %v4169_v53  ;;  %v4264_v52 = vld [vmem:[#allocation7 + $0x124] ss:$16 sps:$4 sm:$0xff]   ;;  %v4267_v53 = vld [vmem:[#allocation7 + $0x12c] ss:$16 sps:$4 sm:$0xff]  }
 0x131   :  { %1798 = vmatprep.subr.bf16.mxu0 %v4174_v54  ;;  %1962 = vmatprep.subr.bf16.mxu1 %v4177_v55  ;;  %v4262_v54 = vld [vmem:[#allocation7 + $0x120] ss:$16 sps:$4 sm:$0xff]   ;;  %v4265_v55 = vld [vmem:[#allocation7 + $0x128] ss:$16 sps:$4 sm:$0xff]  }
 0x134   :  { %1799 = vmatpush1.bf16.msra.mxu0 %v4172_v56  ;;  %1963 = vmatpush1.bf16.msra.mxu1 %v4175_v57  ;;  %v4270_v56 = vld [vmem:[#allocation7 + $0x144] ss:$16 sps:$4 sm:$0xff]   ;;  %v4273_v57 = vld [vmem:[#allocation7 + $0x14c] ss:$16 sps:$4 sm:$0xff]  }
 0x135   :  { %1800 = vmatprep.subr.bf16.mxu0 %v4180_v58  ;;  %1964 = vmatprep.subr.bf16.mxu1 %v4183_v59  ;;  %v4268_v58 = vld [vmem:[#allocation7 + $0x140] ss:$16 sps:$4 sm:$0xff]   ;;  %v4271_v59 = vld [vmem:[#allocation7 + $0x148] ss:$16 sps:$4 sm:$0xff]  }
 0x138   :  { %1801 = vmatpush1.bf16.msra.mxu0 %v4178_v60  ;;  %1965 = vmatpush1.bf16.msra.mxu1 %v4181_v61  ;;  %v4276_v60 = vld [vmem:[#allocation7 + $0x164] ss:$16 sps:$4 sm:$0xff]   ;;  %v4279_v61 = vld [vmem:[#allocation7 + $0x16c] ss:$16 sps:$4 sm:$0xff]  }
 0x139   :  { %1802 = vmatprep.subr.bf16.mxu0 %v4186_v62  ;;  %1966 = vmatprep.subr.bf16.mxu1 %v4189_v63  ;;  %v4274_v62 = vld [vmem:[#allocation7 + $0x160] ss:$16 sps:$4 sm:$0xff]   ;;  %v4277_v63 = vld [vmem:[#allocation7 + $0x168] ss:$16 sps:$4 sm:$0xff]  }
 0x13c   :  { %1803 = vmatpush1.bf16.msra.mxu0 %v4184_v0  ;;  %1967 = vmatpush1.bf16.msra.mxu1 %v4187_v1  ;;  %v4282_v0 = vld [vmem:[#allocation7 + $0x184] ss:$16 sps:$4 sm:$0xff]   ;;  %v4285_v1 = vld [vmem:[#allocation7 + $0x18c] ss:$16 sps:$4 sm:$0xff]  }
 0x13d   :  { %1804 = vmatprep.subr.bf16.mxu0 %v4192_v2  ;;  %1968 = vmatprep.subr.bf16.mxu1 %v4195_v3  ;;  %v4280_v2 = vld [vmem:[#allocation7 + $0x180] ss:$16 sps:$4 sm:$0xff]   ;;  %v4283_v3 = vld [vmem:[#allocation7 + $0x188] ss:$16 sps:$4 sm:$0xff]  }
 0x140   :  { %1805 = vmatpush1.bf16.msra.mxu0 %v4190_v4  ;;  %1969 = vmatpush1.bf16.msra.mxu1 %v4193_v5  ;;  %v4288_v4 = vld [vmem:[#allocation7 + $0x1a4] ss:$16 sps:$4 sm:$0xff]   ;;  %v4291_v5 = vld [vmem:[#allocation7 + $0x1ac] ss:$16 sps:$4 sm:$0xff]  }
 0x141   :  { %1806 = vmatprep.subr.bf16.mxu0 %v4198_v6  ;;  %1970 = vmatprep.subr.bf16.mxu1 %v4201_v7  ;;  %v4286_v6 = vld [vmem:[#allocation7 + $0x1a0] ss:$16 sps:$4 sm:$0xff]   ;;  %v4289_v7 = vld [vmem:[#allocation7 + $0x1a8] ss:$16 sps:$4 sm:$0xff]  }
 0x144   :  { %1807 = vmatpush1.bf16.msra.mxu0 %v4196_v8  ;;  %1971 = vmatpush1.bf16.msra.mxu1 %v4199_v9  ;;  %v4294_v8 = vld [vmem:[#allocation7 + $0x1c4] ss:$16 sps:$4 sm:$0xff]   ;;  %v4297_v9 = vld [vmem:[#allocation7 + $0x1cc] ss:$16 sps:$4 sm:$0xff]  }
 0x145   :  { %1808 = vmatprep.subr.bf16.mxu0 %v4204_v10  ;;  %1972 = vmatprep.subr.bf16.mxu1 %v4207_v11  ;;  %v4292_v10 = vld [vmem:[#allocation7 + $0x1c0] ss:$16 sps:$4 sm:$0xff]   ;;  %v4295_v11 = vld [vmem:[#allocation7 + $0x1c8] ss:$16 sps:$4 sm:$0xff]  }
 0x148   :  { %1809 = vmatpush1.bf16.msra.mxu0 %v4202_v12  ;;  %1973 = vmatpush1.bf16.msra.mxu1 %v4205_v13  ;;  %v4300_v12 = vld [vmem:[#allocation7 + $0x1e4] ss:$16 sps:$4 sm:$0xff]   ;;  %v4303_v13 = vld [vmem:[#allocation7 + $0x1ec] ss:$16 sps:$4 sm:$0xff]  }
 0x149   :  { %2781 = vmatprep.subr.bf16.mxu0 %v4210_v15  ;;  %2863 = vmatprep.subr.bf16.mxu1 %v4213_v16  ;;  %v4301_v15 = vld [vmem:[#allocation7 + $0x1e8] ss:$16 sps:$4 sm:$0xff]   ;;  %v4306_v16 = vld [vmem:[#allocation7 + $0x204] ss:$16 sps:$4 sm:$0xff]  }
 0x14b   :  { %1811 = vmatmul.mubr.bf16.vlgmr.msra.gmra.mrb[0].mxu0 %v95_v17  ;;  %1975 = vmatmul.mubr.bf16.vlgmr.msra.gmra.mrb[0].mxu1 %v95_v17  ;;  %v4309_v17 = vld [vmem:[#allocation7 + $0x20c] ss:$16 sps:$4 sm:$0xff]  }
 0x14c   :  { %2782 = vmatpush1.bf16.msra.mxu0 %v4208_v18  ;;  %2864 = vmatpush1.bf16.msra.mxu1 %v4211_v19  ;;  %v355_v18 = vlaneseq }
 0x14d   :  { %2783 = vmatprep.subr.bf16.mxu0 %v4216_v20  ;;  %2865 = vmatprep.subr.bf16.mxu1 %v4219_v21  ;;  %v4659_v21 = vld [vmem:[%s4707_s2] sm:$0xf] }
 0x14e   :  { %v4653_v19 = vshrl.u32 %v355_v18, 7  ;;  %v4366_v18 = vld [vmem:[#allocation7 + $0x344] ss:$16 sps:$4 sm:$0xff]  }
 0x150   :  { %2784 = vmatpush1.bf16.msra.mxu0 %v4214_v22  ;;  %2866 = vmatpush1.bf16.msra.mxu1 %v4217_v23  ;;  %v357_v20 = vsub.s32 0, %v4653_v19  ;;  %v361_v22 = vsub.s32 1, %v4653_v19  ;;  %v369_v23 = vsub.s32 3, %v4653_v19 }
 0x151   :  { %2785 = vmatprep.subr.bf16.mxu0 %v4222_v24  ;;  %2867 = vmatprep.subr.bf16.mxu1 %v4225_v25 }
 0x152   :  { %v358_v24 = vrot.slane %v4659_v21, %v357_v20  ;;  %v362_v25 = vrot.slane %v4659_v21, %v361_v22 }
 0x154   :  { %2786 = vmatpush1.bf16.msra.mxu0 %v4220_v26  ;;  %2868 = vmatpush1.bf16.msra.mxu1 %v4223_v27  ;;  %v370_v26 = vrot.slane %v4659_v21, %v369_v23 }
 0x155   :  { %2787 = vmatprep.subr.bf16.mxu0 %v4228_v28  ;;  %2869 = vmatprep.subr.bf16.mxu1 %v4231_v29 }
 0x158   :  { %2788 = vmatpush1.bf16.msra.mxu0 %v4226_v30  ;;  %2870 = vmatpush1.bf16.msra.mxu1 %v4229_v31 }
 0x159   :  { %2789 = vmatprep.subr.bf16.mxu0 %v4234_v32  ;;  %2871 = vmatprep.subr.bf16.mxu1 %v4237_v33 }
 0x15c   :  { %2790 = vmatpush1.bf16.msra.mxu0 %v4232_v34  ;;  %2872 = vmatpush1.bf16.msra.mxu1 %v4235_v35 }
 0x15d   :  { %2791 = vmatprep.subr.bf16.mxu0 %v4240_v36  ;;  %2873 = vmatprep.subr.bf16.mxu1 %v4243_v37 }
 0x160   :  { %2792 = vmatpush1.bf16.msra.mxu0 %v4238_v38  ;;  %2874 = vmatpush1.bf16.msra.mxu1 %v4241_v39 }
 0x161   :  { %2793 = vmatprep.subr.bf16.mxu0 %v4246_v40  ;;  %2875 = vmatprep.subr.bf16.mxu1 %v4249_v41 }
 0x164   :  { %2794 = vmatpush1.bf16.msra.mxu0 %v4244_v42  ;;  %2876 = vmatpush1.bf16.msra.mxu1 %v4247_v43  ;;  %v4304_v42 = vld [vmem:[#allocation7 + $0x200] ss:$16 sps:$4 sm:$0xff]   ;;  %v4307_v43 = vld [vmem:[#allocation7 + $0x208] ss:$16 sps:$4 sm:$0xff]  }
 0x165   :  { %2795 = vmatprep.subr.bf16.mxu0 %v4252_v44  ;;  %2877 = vmatprep.subr.bf16.mxu1 %v4255_v45  ;;  %v4312_v45 = vld [vmem:[#allocation7 + $0x224] ss:$16 sps:$4 sm:$0xff]  }
 0x168   :  { %2796 = vmatpush1.bf16.msra.mxu0 %v4250_v46  ;;  %2878 = vmatpush1.bf16.msra.mxu1 %v4253_v47  ;;  %v4315_v46 = vld [vmem:[#allocation7 + $0x22c] ss:$16 sps:$4 sm:$0xff]  }
 0x169   :  { %2797 = vmatprep.subr.bf16.mxu0 %v4258_v48  ;;  %2879 = vmatprep.subr.bf16.mxu1 %v4261_v49  ;;  %v4310_v48 = vld [vmem:[#allocation7 + $0x220] ss:$16 sps:$4 sm:$0xff]   ;;  %v4313_v49 = vld [vmem:[#allocation7 + $0x228] ss:$16 sps:$4 sm:$0xff]  }
 0x16c   :  { %2798 = vmatpush1.bf16.msra.mxu0 %v4256_v50  ;;  %2880 = vmatpush1.bf16.msra.mxu1 %v4259_v51  ;;  %v4318_v50 = vld [vmem:[#allocation7 + $0x244] ss:$16 sps:$4 sm:$0xff]   ;;  %v4321_v51 = vld [vmem:[#allocation7 + $0x24c] ss:$16 sps:$4 sm:$0xff]  }
 0x16d   :  { %2799 = vmatprep.subr.bf16.mxu0 %v4264_v52  ;;  %2881 = vmatprep.subr.bf16.mxu1 %v4267_v53  ;;  %v4316_v52 = vld [vmem:[#allocation7 + $0x240] ss:$16 sps:$4 sm:$0xff]   ;;  %v4319_v53 = vld [vmem:[#allocation7 + $0x248] ss:$16 sps:$4 sm:$0xff]  }
 0x170   :  { %2800 = vmatpush1.bf16.msra.mxu0 %v4262_v54  ;;  %2882 = vmatpush1.bf16.msra.mxu1 %v4265_v55  ;;  %v4324_v54 = vld [vmem:[#allocation7 + $0x264] ss:$16 sps:$4 sm:$0xff]   ;;  %v4327_v55 = vld [vmem:[#allocation7 + $0x26c] ss:$16 sps:$4 sm:$0xff]  }
 0x171   :  { %2801 = vmatprep.subr.bf16.mxu0 %v4270_v56  ;;  %2883 = vmatprep.subr.bf16.mxu1 %v4273_v57  ;;  %v4322_v56 = vld [vmem:[#allocation7 + $0x260] ss:$16 sps:$4 sm:$0xff]   ;;  %v4325_v57 = vld [vmem:[#allocation7 + $0x268] ss:$16 sps:$4 sm:$0xff]  }
 0x174   :  { %2802 = vmatpush1.bf16.msra.mxu0 %v4268_v58  ;;  %2884 = vmatpush1.bf16.msra.mxu1 %v4271_v59  ;;  %v4330_v58 = vld [vmem:[#allocation7 + $0x284] ss:$16 sps:$4 sm:$0xff]   ;;  %v4333_v59 = vld [vmem:[#allocation7 + $0x28c] ss:$16 sps:$4 sm:$0xff]  }
 0x175   :  { %2803 = vmatprep.subr.bf16.mxu0 %v4276_v60  ;;  %2885 = vmatprep.subr.bf16.mxu1 %v4279_v61  ;;  %v4328_v60 = vld [vmem:[#allocation7 + $0x280] ss:$16 sps:$4 sm:$0xff]   ;;  %v4331_v61 = vld [vmem:[#allocation7 + $0x288] ss:$16 sps:$4 sm:$0xff]  }
 0x178   :  { %2804 = vmatpush1.bf16.msra.mxu0 %v4274_v62  ;;  %2886 = vmatpush1.bf16.msra.mxu1 %v4277_v63  ;;  %v4336_v62 = vld [vmem:[#allocation7 + $0x2a4] ss:$16 sps:$4 sm:$0xff]   ;;  %v4339_v63 = vld [vmem:[#allocation7 + $0x2ac] ss:$16 sps:$4 sm:$0xff]  }
 0x179   :  { %2805 = vmatprep.subr.bf16.mxu0 %v4282_v0  ;;  %2887 = vmatprep.subr.bf16.mxu1 %v4285_v1  ;;  %v4334_v0 = vld [vmem:[#allocation7 + $0x2a0] ss:$16 sps:$4 sm:$0xff]   ;;  %v4337_v1 = vld [vmem:[#allocation7 + $0x2a8] ss:$16 sps:$4 sm:$0xff]  }
 0x17c   :  { %2806 = vmatpush1.bf16.msra.mxu0 %v4280_v2  ;;  %2888 = vmatpush1.bf16.msra.mxu1 %v4283_v3  ;;  %v4342_v2 = vld [vmem:[#allocation7 + $0x2c4] ss:$16 sps:$4 sm:$0xff]   ;;  %v4345_v3 = vld [vmem:[#allocation7 + $0x2cc] ss:$16 sps:$4 sm:$0xff]  }
 0x17d   :  { %2807 = vmatprep.subr.bf16.mxu0 %v4288_v4  ;;  %2889 = vmatprep.subr.bf16.mxu1 %v4291_v5  ;;  %v4340_v4 = vld [vmem:[#allocation7 + $0x2c0] ss:$16 sps:$4 sm:$0xff]   ;;  %v4343_v5 = vld [vmem:[#allocation7 + $0x2c8] ss:$16 sps:$4 sm:$0xff]  }
 0x180   :  { %2808 = vmatpush1.bf16.msra.mxu0 %v4286_v6  ;;  %2890 = vmatpush1.bf16.msra.mxu1 %v4289_v7  ;;  %v4348_v6 = vld [vmem:[#allocation7 + $0x2e4] ss:$16 sps:$4 sm:$0xff]   ;;  %v4351_v7 = vld [vmem:[#allocation7 + $0x2ec] ss:$16 sps:$4 sm:$0xff]  }
 0x181   :  { %2809 = vmatprep.subr.bf16.mxu0 %v4294_v8  ;;  %2891 = vmatprep.subr.bf16.mxu1 %v4297_v9  ;;  %v4346_v8 = vld [vmem:[#allocation7 + $0x2e0] ss:$16 sps:$4 sm:$0xff]   ;;  %v4349_v9 = vld [vmem:[#allocation7 + $0x2e8] ss:$16 sps:$4 sm:$0xff]  }
 0x184   :  { %2810 = vmatpush1.bf16.msra.mxu0 %v4292_v10  ;;  %2892 = vmatpush1.bf16.msra.mxu1 %v4295_v11  ;;  %v4354_v10 = vld [vmem:[#allocation7 + $0x304] ss:$16 sps:$4 sm:$0xff]   ;;  %v4357_v11 = vld [vmem:[#allocation7 + $0x30c] ss:$16 sps:$4 sm:$0xff]  }
 0x185   :  { %2811 = vmatprep.subr.bf16.mxu0 %v4300_v12  ;;  %2893 = vmatprep.subr.bf16.mxu1 %v4303_v13  ;;  %v4352_v12 = vld [vmem:[#allocation7 + $0x300] ss:$16 sps:$4 sm:$0xff]   ;;  %v4355_v13 = vld [vmem:[#allocation7 + $0x308] ss:$16 sps:$4 sm:$0xff]  }
 0x188   :  { %2812 = vmatpush1.bf16.msra.mxu0 %v4298_v14  ;;  %2894 = vmatpush1.bf16.msra.mxu1 %v4301_v15  ;;  %v4360_v14 = vld [vmem:[#allocation7 + $0x324] ss:$16 sps:$4 sm:$0xff]   ;;  %v4363_v15 = vld [vmem:[#allocation7 + $0x32c] ss:$16 sps:$4 sm:$0xff]  }
 0x189   :  { %2822 = vmatprep.subr.bf16.mxu0 %v4306_v16  ;;  %2904 = vmatprep.subr.bf16.mxu1 %v4309_v17  ;;  %v4358_v16 = vld [vmem:[#allocation7 + $0x320] ss:$16 sps:$4 sm:$0xff]   ;;  %v4361_v17 = vld [vmem:[#allocation7 + $0x328] ss:$16 sps:$4 sm:$0xff]  }
 0x21e   :  { %v1812_v27 = vpop.f32.mrb[0].mxu0  ;;  %v4672_v28 = vpop.f32.mrb[0].mxu1 }
 0x21f   :  { %v3775_v29 = vadd.f32 %v1812_v27, %v358_v24  ;;  %v1814_v30 = vpop.f32.mrb[1].mxu0  ;;  %v1978_v31 = vpop.f32.mrb[1].mxu1  ;;  %v4369_v24 = vld [vmem:[#allocation7 + $0x34c] ss:$16 sps:$4 sm:$0xff]   ;;  %v4372_v27 = vld [vmem:[#allocation7 + $0x364] ss:$16 sps:$4 sm:$0xff]  }
 0x220   :  { %v3776_v32 = vadd.f32 %v1814_v30, %v362_v25  ;;  %v3778_v33 = vadd.f32 %v1978_v31, %v370_v26  ;;  %v1816_v34 = vpop.f32.mrb[2].mxu0  ;;  %v1980_v35 = vpop.f32.mrb[2].mxu1  ;;  %v4364_v25 = vld [vmem:[#allocation7 + $0x340] ss:$16 sps:$4 sm:$0xff]   ;;  %v4367_v26 = vld [vmem:[#allocation7 + $0x348] ss:$16 sps:$4 sm:$0xff]  }
 0x221   :  { %v1983_v36 = vmax.f32 %v3775_v29, 0.0  ;;  %v1817_v37 = vpop.f32.mrb[3].mxu0  ;;  %v1981_v38 = vpop.f32.mrb[3].mxu1  ;;  %v4375_v29 = vld [vmem:[#allocation7 + $0x36c] ss:$16 sps:$4 sm:$0xff]  }
 0x222   :  { %v1984_v39 = vmax.f32 %v3776_v32, 0.0  ;;  %v1986_v40 = vmax.f32 %v3778_v33, 0.0  ;;  %v4370_v30 = vld [vmem:[#allocation7 + $0x360] ss:$16 sps:$4 sm:$0xff]   ;;  %v4373_v31 = vld [vmem:[#allocation7 + $0x368] ss:$16 sps:$4 sm:$0xff]  }
 0x223   :  { %v1987_v44 = vpack.c.bf16 %v1983_v36, %v1983_v36  ;;  %v4378_v32 = vld [vmem:[#allocation7 + $0x384] ss:$16 sps:$4 sm:$0xff]   ;;  %v4381_v33 = vld [vmem:[#allocation7 + $0x38c] ss:$16 sps:$4 sm:$0xff]   ;;  %v4376_v34 = vld [vmem:[#allocation7 + $0x380] ss:$16 sps:$4 sm:$0xff]  }
 0x224   :  { %v1988_v41 = vpack.c.bf16 %v1984_v39, %v1984_v39  ;;  %v1990_v47 = vpack.c.bf16 %v1986_v40, %v1986_v40  ;;  %v4379_v35 = vld [vmem:[#allocation7 + $0x388] ss:$16 sps:$4 sm:$0xff]   ;;  %v365_v36 = vsub.s32 2, %v4653_v19  ;;  %v4384_v37 = vld [vmem:[#allocation7 + $0x3a4] ss:$16 sps:$4 sm:$0xff]  }
 0x225   :  { %v4387_v38 = vld [vmem:[#allocation7 + $0x3ac] ss:$16 sps:$4 sm:$0xff]   ;;  %v4382_v39 = vld [vmem:[#allocation7 + $0x3a0] ss:$16 sps:$4 sm:$0xff]   ;;  %v4385_v40 = vld [vmem:[#allocation7 + $0x3a8] ss:$16 sps:$4 sm:$0xff]  }
 0x226   :  { %2813 = vmatprep.mubr.bf16.mxu0 %v1988_v41  ;;  %2895 = vmatprep.mubr.bf16.mxu1 %v1988_v41  ;;  %v366_v41 = vrot.slane %v4659_v21, %v365_v36  ;;  %v4400_v21 = vld [vmem:[#allocation8 + $0x40] sm:$0xff]  }
 0x227   :  { %2814 = vmatmul.mubr.bf16.vlgmr.msra.gmra.mrb[4].mxu0 %v1987_v44  ;;  %2896 = vmatmul.mubr.bf16.vlgmr.msra.gmra.mrb[4].mxu1 %v1987_v44  ;;  %v4388_v44 = vld [vmem:[#allocation7 + $0x3c0] ss:$16 sps:$4 sm:$0xff]  }
 0x228   :  { %2823 = vmatpush1.bf16.msra.mxu0 %v4304_v42  ;;  %2905 = vmatpush1.bf16.msra.mxu1 %v4307_v43  ;;  %v4390_v42 = vld [vmem:[#allocation7 + $0x3c4] ss:$16 sps:$4 sm:$0xff]   ;;  %v4393_v43 = vld [vmem:[#allocation7 + $0x3cc] ss:$16 sps:$4 sm:$0xff]  }
 0x229   :  { %2854 = vmatprep.mubr.bf16.mxu0 %v1990_v47  ;;  %2936 = vmatprep.mubr.bf16.mxu1 %v1990_v47  ;;  %v4396_v47 = vld [vmem:[#allocation7 + $0x3e4] ss:$16 sps:$4 sm:$0xff]  }
 0x22a   :  { %2824 = vmatprep.subr.bf16.mxu0 %v4312_v45  ;;  %2906 = vmatprep.subr.bf16.mxu1 %v4315_v46  ;;  %v4391_v45 = vld [vmem:[#allocation7 + $0x3c8] ss:$16 sps:$4 sm:$0xff]   ;;  %v3777_v46 = vadd.f32 %v4672_v28, %v366_v41 }
 0x22b   :  { %v4404_v28 = vld [vmem:[#allocation8 + $0x48] sm:$0xff]  }
 0x22c   :  { %2825 = vmatpush1.bf16.msra.mxu0 %v4310_v48  ;;  %2907 = vmatpush1.bf16.msra.mxu1 %v4313_v49  ;;  %v4399_v48 = vld [vmem:[#allocation7 + $0x3ec] ss:$16 sps:$4 sm:$0xff]   ;;  %v4394_v49 = vld [vmem:[#allocation7 + $0x3e0] ss:$16 sps:$4 sm:$0xff]  }
 0x22d   :  { %2826 = vmatprep.subr.bf16.mxu0 %v4318_v50  ;;  %2908 = vmatprep.subr.bf16.mxu1 %v4321_v51  ;;  %v4397_v50 = vld [vmem:[#allocation7 + $0x3e8] ss:$16 sps:$4 sm:$0xff]   ;;  %v1985_v51 = vmax.f32 %v3777_v46, 0.0 }
 0x230   :  { %2827 = vmatpush1.bf16.msra.mxu0 %v4316_v52  ;;  %2909 = vmatpush1.bf16.msra.mxu1 %v4319_v53  ;;  %v4401_v52 = vld [vmem:[#allocation8 + $0xc0] sm:$0xff]  }
 0x231   :  { %2828 = vmatprep.subr.bf16.mxu0 %v4324_v54  ;;  %2910 = vmatprep.subr.bf16.mxu1 %v4327_v55  ;;  %v4402_v53 = vld [vmem:[#allocation8] sm:$0xff]   ;;  %v1989_v55 = vpack.c.bf16 %v1985_v51, %v1985_v51 }
 0x232   :  { %v4403_v54 = vld [vmem:[#allocation8 + $0x80] sm:$0xff]  }
 0x234   :  { %2829 = vmatpush1.bf16.msra.mxu0 %v4322_v56  ;;  %2911 = vmatpush1.bf16.msra.mxu1 %v4325_v57  ;;  %v4405_v56 = vld [vmem:[#allocation8 + $0xc8] sm:$0xff]  }
 0x235   :  { %2830 = vmatprep.subr.bf16.mxu0 %v4330_v58  ;;  %2912 = vmatprep.subr.bf16.mxu1 %v4333_v59  ;;  %v4406_v57 = vld [vmem:[#allocation8 + $0x8] sm:$0xff]   ;;  %v4408_v59 = vld [vmem:[#allocation8 + $0x50] sm:$0xff]  }
 0x236   :  { %v4407_v58 = vld [vmem:[#allocation8 + $0x88] sm:$0xff]  }
 0x238   :  { %2831 = vmatpush1.bf16.msra.mxu0 %v4328_v60  ;;  %2913 = vmatpush1.bf16.msra.mxu1 %v4331_v61  ;;  %v4409_v60 = vld [vmem:[#allocation8 + $0xd0] sm:$0xff]  }
 0x239   :  { %2832 = vmatprep.subr.bf16.mxu0 %v4336_v62  ;;  %2914 = vmatprep.subr.bf16.mxu1 %v4339_v63  ;;  %v4410_v61 = vld [vmem:[#allocation8 + $0x10] sm:$0xff]   ;;  %v4412_v63 = vld [vmem:[#allocation8 + $0x58] sm:$0xff]  }
 0x23a   :  { %v4411_v62 = vld [vmem:[#allocation8 + $0x90] sm:$0xff]  }
 0x23c   :  { %2833 = vmatpush1.bf16.msra.mxu0 %v4334_v0  ;;  %2915 = vmatpush1.bf16.msra.mxu1 %v4337_v1  ;;  %v4413_v0 = vld [vmem:[#allocation8 + $0xd8] sm:$0xff]  }
 0x23d   :  { %2834 = vmatprep.subr.bf16.mxu0 %v4342_v2  ;;  %2916 = vmatprep.subr.bf16.mxu1 %v4345_v3  ;;  %v4414_v1 = vld [vmem:[#allocation8 + $0x18] sm:$0xff]   ;;  %v4416_v3 = vld [vmem:[#allocation8 + $0x60] sm:$0xff]  }
 0x23e   :  { %v4415_v2 = vld [vmem:[#allocation8 + $0x98] sm:$0xff]  }
 0x240   :  { %2835 = vmatpush1.bf16.msra.mxu0 %v4340_v4  ;;  %2917 = vmatpush1.bf16.msra.mxu1 %v4343_v5  ;;  %v4417_v4 = vld [vmem:[#allocation8 + $0xe0] sm:$0xff]  }
 0x241   :  { %2836 = vmatprep.subr.bf16.mxu0 %v4348_v6  ;;  %2918 = vmatprep.subr.bf16.mxu1 %v4351_v7  ;;  %v4418_v5 = vld [vmem:[#allocation8 + $0x20] sm:$0xff]   ;;  %v4420_v7 = vld [vmem:[#allocation8 + $0x68] sm:$0xff]  }
 0x242   :  { %v4419_v6 = vld [vmem:[#allocation8 + $0xa0] sm:$0xff]  }
 0x244   :  { %2837 = vmatpush1.bf16.msra.mxu0 %v4346_v8  ;;  %2919 = vmatpush1.bf16.msra.mxu1 %v4349_v9  ;;  %v4421_v8 = vld [vmem:[#allocation8 + $0xe8] sm:$0xff]  }
 0x245   :  { %2838 = vmatprep.subr.bf16.mxu0 %v4354_v10  ;;  %2920 = vmatprep.subr.bf16.mxu1 %v4357_v11  ;;  %v4422_v9 = vld [vmem:[#allocation8 + $0x28] sm:$0xff]   ;;  %v4424_v11 = vld [vmem:[#allocation8 + $0x70] sm:$0xff]  }
 0x246   :  { %v4423_v10 = vld [vmem:[#allocation8 + $0xa8] sm:$0xff]  }
 0x248   :  { %2839 = vmatpush1.bf16.msra.mxu0 %v4352_v12  ;;  %2921 = vmatpush1.bf16.msra.mxu1 %v4355_v13  ;;  %v4425_v12 = vld [vmem:[#allocation8 + $0xf0] sm:$0xff]  }
 0x249   :  { %2840 = vmatprep.subr.bf16.mxu0 %v4360_v14  ;;  %2922 = vmatprep.subr.bf16.mxu1 %v4363_v15  ;;  %v4426_v13 = vld [vmem:[#allocation8 + $0x30] sm:$0xff]   ;;  %v4428_v15 = vld [vmem:[#allocation8 + $0x78] sm:$0xff]  }
 0x24a   :  { %v4427_v14 = vld [vmem:[#allocation8 + $0xb0] sm:$0xff]  }
 0x24c   :  { %2841 = vmatpush1.bf16.msra.mxu0 %v4358_v16  ;;  %2923 = vmatpush1.bf16.msra.mxu1 %v4361_v17  ;;  %v4429_v16 = vld [vmem:[#allocation8 + $0xf8] sm:$0xff]  }
 0x24d   :  { %2842 = vmatprep.subr.bf16.mxu0 %v4366_v18  ;;  %2924 = vmatprep.subr.bf16.mxu1 %v4369_v24  ;;  %v4430_v17 = vld [vmem:[#allocation8 + $0x38] sm:$0xff]   ;;  %v2119_v24 = vld [vmem:[%s4709_s4] sm:$0xf] }
 0x24e   :  { %v4431_v18 = vld [vmem:[#allocation8 + $0xb8] sm:$0xff]  }
 0x250   :  { %2843 = vmatpush1.bf16.msra.mxu0 %v4364_v25  ;;  %2925 = vmatpush1.bf16.msra.mxu1 %v4367_v26  ;;  %v2124_v25 = vrot.slane %v2119_v24, %v357_v20  ;;  %v2132_v26 = vrot.slane %v2119_v24, %v365_v36 }
 0x251   :  { %2844 = vmatprep.subr.bf16.mxu0 %v4372_v27  ;;  %2926 = vmatprep.subr.bf16.mxu1 %v4375_v29  ;;  %v2128_v27 = vrot.slane %v2119_v24, %v361_v22  ;;  %v2136_v29 = vrot.slane %v2119_v24, %v369_v23 }
 0x254   :  { %2845 = vmatpush1.bf16.msra.mxu0 %v4370_v30  ;;  %2927 = vmatpush1.bf16.msra.mxu1 %v4373_v31 }
 0x255   :  { %2846 = vmatprep.subr.bf16.mxu0 %v4378_v32  ;;  %2928 = vmatprep.subr.bf16.mxu1 %v4381_v33 }
 0x258   :  { %2847 = vmatpush1.bf16.msra.mxu0 %v4376_v34  ;;  %2929 = vmatpush1.bf16.msra.mxu1 %v4379_v35 }
 0x259   :  { %2848 = vmatprep.subr.bf16.mxu0 %v4384_v37  ;;  %2930 = vmatprep.subr.bf16.mxu1 %v4387_v38 }
 0x25c   :  { %2849 = vmatpush1.bf16.msra.mxu0 %v4382_v39  ;;  %2931 = vmatpush1.bf16.msra.mxu1 %v4385_v40 }
 0x25d   :  { %2850 = vmatprep.subr.bf16.mxu0 %v4390_v42  ;;  %2932 = vmatprep.subr.bf16.mxu1 %v4393_v43 }
 0x260   :  { %2851 = vmatpush1.bf16.msra.mxu0 %v4388_v44  ;;  %2933 = vmatpush1.bf16.msra.mxu1 %v4391_v45 }
 0x261   :  { %2852 = vmatprep.subr.bf16.mxu0 %v4396_v47  ;;  %2934 = vmatprep.subr.bf16.mxu1 %v4399_v48  ;;  %v3698_v48 = vld [vmem:[%s4711_s6] ss:$0 sm:$0xff] }
 0x264   :  { %2853 = vmatpush1.bf16.msra.mxu0 %v4394_v49  ;;  %2935 = vmatpush1.bf16.msra.mxu1 %v4397_v50 }
 0x265   :  { %3731 = vmatprep.subr.bf16.mxu0 %v4400_v21  ;;  %3753 = vmatprep.subr.bf16.mxu1 %v4401_v52 }
 0x267   :  { %2855 = vmatmul.mubr.bf16.vlgmr.msra.gmra.mrb[4].mxu0 %v1989_v55  ;;  %2937 = vmatmul.mubr.bf16.vlgmr.msra.gmra.mrb[4].mxu1 %v1989_v55 }
 0x268   :  { %3732 = vmatpush3.bf16.msra.mxu0 %v4402_v53  ;;  %3754 = vmatpush3.bf16.msra.mxu1 %v4403_v54 }
 0x269   :  { %3733 = vmatprep.subr.bf16.mxu0 %v4404_v28  ;;  %3755 = vmatprep.subr.bf16.mxu1 %v4405_v56 }
 0x26c   :  { %3734 = vmatpush3.bf16.msra.mxu0 %v4406_v57  ;;  %3756 = vmatpush3.bf16.msra.mxu1 %v4407_v58 }
 0x26d   :  { %3735 = vmatprep.subr.bf16.mxu0 %v4408_v59  ;;  %3757 = vmatprep.subr.bf16.mxu1 %v4409_v60 }
 0x270   :  { %3736 = vmatpush3.bf16.msra.mxu0 %v4410_v61  ;;  %3758 = vmatpush3.bf16.msra.mxu1 %v4411_v62 }
 0x271   :  { %3737 = vmatprep.subr.bf16.mxu0 %v4412_v63  ;;  %3759 = vmatprep.subr.bf16.mxu1 %v4413_v0 }
 0x274   :  { %3738 = vmatpush3.bf16.msra.mxu0 %v4414_v1  ;;  %3760 = vmatpush3.bf16.msra.mxu1 %v4415_v2 }
 0x275   :  { %3739 = vmatprep.subr.bf16.mxu0 %v4416_v3  ;;  %3761 = vmatprep.subr.bf16.mxu1 %v4417_v4 }
 0x278   :  { %3740 = vmatpush3.bf16.msra.mxu0 %v4418_v5  ;;  %3762 = vmatpush3.bf16.msra.mxu1 %v4419_v6 }
 0x279   :  { %3741 = vmatprep.subr.bf16.mxu0 %v4420_v7  ;;  %3763 = vmatprep.subr.bf16.mxu1 %v4421_v8 }
 0x27c   :  { %3742 = vmatpush3.bf16.msra.mxu0 %v4422_v9  ;;  %3764 = vmatpush3.bf16.msra.mxu1 %v4423_v10 }
 0x27d   :  { %3743 = vmatprep.subr.bf16.mxu0 %v4424_v11  ;;  %3765 = vmatprep.subr.bf16.mxu1 %v4425_v12 }
 0x280   :  { %3744 = vmatpush3.bf16.msra.mxu0 %v4426_v13  ;;  %3766 = vmatpush3.bf16.msra.mxu1 %v4427_v14 }
 0x281   :  { %3745 = vmatprep.subr.bf16.mxu0 %v4428_v15  ;;  %3767 = vmatprep.subr.bf16.mxu1 %v4429_v16 }
 0x284   :  { %3746 = vmatpush3.bf16.msra.mxu0 %v4430_v17  ;;  %3768 = vmatpush3.bf16.msra.mxu1 %v4431_v18 }
 0x33a   :  { %v2856_v30 = vpop.f32.mrb[4].mxu0  ;;  %v2938_v31 = vpop.f32.mrb[4].mxu1 }
 0x33b   :  { %v3779_v32 = vadd.f32 %v2856_v30, %v2124_v25  ;;  %v3781_v33 = vadd.f32 %v2938_v31, %v2132_v26  ;;  %v2858_v34 = vpop.f32.mrb[5].mxu0  ;;  %v2940_v35 = vpop.f32.mrb[5].mxu1 }
 0x33c   :  { %v3780_v37 = vadd.f32 %v2858_v34, %v2128_v27  ;;  %v3782_v38 = vadd.f32 %v2940_v35, %v2136_v29  ;;  %v2860_v39 = vpop.f32.mrb[6].mxu0  ;;  %v2942_v40 = vpop.f32.mrb[6].mxu1 }
 0x33d   :  { %v2945_v20 = vmax.f32 %v3779_v32, 0.0  ;;  %v2947_v41 = vmax.f32 %v3781_v33, 0.0  ;;  %v2861_v42 = vpop.f32.mrb[7].mxu0  ;;  %v2943_v36 = vpop.f32.mrb[7].mxu1 }
 0x33e   :  { %v2946_v43 = vmax.f32 %v3780_v37, 0.0  ;;  %v2948_v44 = vmax.f32 %v3782_v38, 0.0 }
 0x33f   :  { %v2949_v19 = vpack.c.bf16 %v2945_v20, %v2945_v20  ;;  %v2951_v23 = vpack.c.bf16 %v2947_v41, %v2947_v41 }
 0x340   :  { %v2950_v22 = vpack.c.bf16 %v2946_v43, %v2946_v43  ;;  %v2952_v45 = vpack.c.bf16 %v2948_v44, %v2948_v44 }
 0x342   :  { %3248 = vmatprep.mubr.bf16.mxu0 %v2950_v22  ;;  %3288 = vmatprep.mubr.bf16.mxu1 %v2952_v45 }
 0x343   :  { %3249 = vmatmul.mubr.bf16.vlgmr.msra.gmra.mrb[8].mxu0 %v2949_v19  ;;  %3289 = vmatmul.mubr.bf16.vlgmr.msra.gmra.mrb[8].mxu1 %v2951_v23 }
 0x416   :  { %v3747_v46 = vpop.f32.mrb[8].mxu0  ;;  %v3769_v47 = vpop.f32.mrb[8].mxu1 }
 0x417   :  { %v3748_v49 = vpop.f32.mrb[9].mxu0  ;;  %v3770_v50 = vpop.f32.mrb[9].mxu1 }
 0x418   :  { %v3749_v51 = vadd.f32 %v3748_v49, %v3747_v46  ;;  %v3771_v21 = vadd.f32 %v3770_v50, %v3769_v47  ;;  %v3750_v52 = vpop.f32.mrb[10].mxu0  ;;  %v3772_v53 = vpop.f32.mrb[10].mxu1 }
 0x419   :  { %v3751_v54 = vpop.f32.mrb[11].mxu0  ;;  %v3773_v55 = vpop.f32.mrb[11].mxu1 }
 0x41a   :  { %v3251_v28 = vadd.f32 %v3749_v51, %v3698_v48 }
 0x41c   :  { %v3291_v56 = vadd.f32 %v3771_v21, %v3251_v28 }
 0x41e   :  { %3296 = vst [vmem:[#allocation10] sm:$0xff] %v3291_v56 }
 0x41f   :  { %4531 = shalt.err (!%p4528_p8)
}
 0x420   :  { %s4532_s10 = scalar_lea.hbm %s4712_s7, 128 }
 0x421   :  { %p4533_p9 = scmp.ne.s32.totalorder %s4712_s7, %s4532_s10  ;;  %p4536_p10 = scmp.lt.u32.totalorder %s4532_s10, %s4712_s7 }
 0x423   :  { %p4538_p11 = pnand %p4536_p10, %p4533_p9 }
 0x425   :  { %4541 = shalt.err (!%p4538_p11)
}
 0x426   :  { %3306 = dma.vmem_to_hbm [thread:$0]  %s3304_s30, 128, %s4712_s7, [#allocation4]  }
 0x427   :  { %4548 = dma.done.wait [#allocation4], 128  }
 0x428   :  { %4549 = vsyncadd [#allocation4], 4294967168 }
 0x429   :  { %3310 = vsyncpa [#allocation3], 1 }
 0x42a   :  { %3311 = vsyncpa [#allocation6], 1 }
 0x42b   :  { %3312 = vsyncpa [#allocation9], 1 }
 0x42c   :  { %3313 = vsyncpa [#allocation4], 1 }

</bundles_post_ra>
